<compile_context>
chip_gen: v6e
topology: v6e:2x2x1
jax: 0.10.0
libtpu: 0.0.40
codegen_flags: <defaults>
</compile_context>

<pallas_src>
import math

import jax
import jax.numpy as jnp
from jax.experimental import pallas as pl
from jax.experimental.pallas import tpu as pltpu

# ---- model config (small synthetic BERT, lane-dense dims) ----
VOCAB = 128
MAX_POS = 16
HIDDEN = 128          # stands in for 768; multiple of 128 -> lane-dense
NUM_HEADS = 4
HEAD_DIM = HIDDEN // NUM_HEADS
FFN = 512             # 4*H, multiple of 128
NUM_LAYERS = 2
NUM_CLASSES = 10
CLS_PAD = 128         # classifier output padded to a full lane width
LN_EPS = 1e-12
PVEC_ROWS = 8         # packed per-layer bias/LN slab rows


# ------------------------- in-kernel helpers -------------------------

def _gelu(y):
    # TODO(synk): HF BERT default is the exact erf GELU; tanh variant drifts slightly.
    c = math.sqrt(2.0 / math.pi)
    return 0.5 * y * (1.0 + jnp.tanh(c * (y + 0.044715 * y * y * y)))


def _layernorm(h, g, b):
    # h: (M, H) f32; g, b: (1, H) f32
    mu = jnp.mean(h, axis=-1, keepdims=True)
    var = jnp.mean(jnp.square(h - mu), axis=-1, keepdims=True)
    return (h - mu) * jax.lax.rsqrt(var + LN_EPS) * g + b


def _bf16_dot(a_f32, w_bf16, b_f32):
    # bf16 MXU operands, f32 accumulation, f32 bias add.
    return jnp.dot(a_f32.astype(jnp.bfloat16), w_bf16,
                   preferred_element_type=jnp.float32) + b_f32


# ------------------------- kernel 1: embeddings + LayerNorm -------------------------

def _embed_ln_kernel(we_ref, pe_ref, te_ref, ln_ref, o_ref):
    B, S, H = we_ref.shape
    h = (we_ref[...] + pe_ref[...] + te_ref[...]).reshape(B * S, H)
    o_ref[...] = _layernorm(h, ln_ref[0:1, :], ln_ref[1:2, :]).reshape(B, S, H)


def embed_layernorm(we, pe, te, emb_ln):
    B, S, H = we.shape
    spec = lambda shape: pl.BlockSpec(shape, lambda i, _s=shape: (0,) * len(_s))
    return pl.pallas_call(
        _embed_ln_kernel,
        grid=(1,),
        in_specs=[spec((B, S, H)), spec((1, S, H)), spec((1, 1, H)), spec((2, H))],
        out_specs=spec((B, S, H)),
        out_shape=jax.ShapeDtypeStruct((B, S, H), jnp.float32),
        compiler_params=pltpu.CompilerParams(dimension_semantics=("arbitrary",)),
    )(we, pe, te, emb_ln)


# --------------- kernel 2: fused encoder stack + pooler + classifier ---------------

def _bert_stack_kernel(x_ref, bias_ref,
                       wqkv_ref, wo_ref, w1_ref, w2_ref, pv_ref,
                       wp_ref, wc_ref, hb_ref,
                       o_ref, h_sc, ctx_sc):
    # One grid step == one transformer layer; next layer's weights are
    # prefetched by the Pallas pipeline while this one computes.
    # TODO(synk): at BERT-base sizes, tile M=B*S rows (mark that axis "parallel"
    # for v7x's 2 TCs) and switch to KV-tiled flash-style attention; budget
    # double-buffered weights against v7x's 64 MiB VMEM.
    l = pl.program_id(0)
    B, S, H = x_ref.shape
    M = B * S

    @pl.when(l == 0)
    def _():
        h_sc[...] = x_ref[...].reshape(M, H)

    x = h_sc[...]                                          # (M, H) f32 carried activation
    bias = bias_ref[...]                                   # (B, S) additive key mask
    # TODO(synk): bias has S(<128) lanes -> masked narrow vregs; pad/pre-broadcast
    # once S grows beyond toy size.

    # ---- unpack the per-layer packed bias/LN slab (one DMA instead of ten) ----
    pv = pv_ref[...]                                       # (8, FFN) f32
    bqkv = pv[0:1, :3 * H]
    b1 = pv[1:2, :]
    bo = pv[2:3, :H]
    ln1g, ln1b = pv[3:4, :H], pv[4:5, :H]
    b2 = pv[5:6, :H]
    ln2g, ln2b = pv[6:7, :H], pv[7:8, :H]

    # ---- fused QKV projection: one MXU pass, N = 3H ----
    qkv = _bf16_dot(x, wqkv_ref[...], bqkv).reshape(B, S, 3 * H)
    q, k, v = qkv[:, :, :H], qkv[:, :, H:2 * H], qkv[:, :, 2 * H:]

    # ---- multi-head attention; per-head results written to VMEM scratch ----
    scale = 1.0 / math.sqrt(HEAD_DIM)
    for hd in range(NUM_HEADS):
        sl = slice(hd * HEAD_DIM, (hd + 1) * HEAD_DIM)
        qh = q[:, :, sl].astype(jnp.bfloat16)
        kh = k[:, :, sl].astype(jnp.bfloat16)
        vh = v[:, :, sl].astype(jnp.bfloat16)
        s = jnp.einsum('bqd,bkd->bqk', qh, kh,
                       preferred_element_type=jnp.float32) * scale
        s = s + bias[:, None, :]                           # mask over keys
        s = s - jnp.max(s, axis=-1, keepdims=True)
        p = jnp.exp(s)
        p = p * pl.reciprocal(jnp.sum(p, axis=-1, keepdims=True), approx=True)
        ctx_h = jnp.einsum('bqk,bkd->bqd', p.astype(jnp.bfloat16), vh,
                           preferred_element_type=jnp.float32)
        ctx_sc[:, sl] = ctx_h.reshape(M, HEAD_DIM)          # no lane-dim concatenate

    # ---- output projection + residual + LayerNorm ----
    attn = _bf16_dot(ctx_sc[...], wo_ref[...], bo)
    h1 = _layernorm(attn + x, ln1g, ln1b)

    # ---- GELU FFN + residual + LayerNorm ----
    ff = _gelu(_bf16_dot(h1, w1_ref[...], b1))
    h2 = _layernorm(_bf16_dot(ff, w2_ref[...], b2) + h1, ln2g, ln2b)
    h_sc[...] = h2                                          # carry to next layer (VMEM only)

    # ---- pooler + classifier head, only at the last layer (CLS read from VMEM) ----
    @pl.when(l == pl.num_programs(0) - 1)
    def _():
        cls = h2.reshape(B, S, H)[:, 0, :]                  # (B, H) CLS rows
        pooled = jnp.tanh(_bf16_dot(cls, wp_ref[...], hb_ref[0:1, :H]))  # BERT pooler
        # nn.Dropout(0.3) is the identity in eval/inference mode.
        logits = _bf16_dot(pooled, wc_ref[...], hb_ref[1:2, :])          # (B, CLS_PAD)
        o_ref[...] = jnp.maximum(logits, 0.0)               # ReLU


def bert_encoder_and_head(x, bias, stacked, pooler_w, cls_w_pad, head_bias):
    B, S, H = x.shape
    const3 = lambda l: (0, 0, 0)
    const2 = lambda l: (0, 0)
    per_layer = lambda l: (l, 0, 0)
    return pl.pallas_call(
        _bert_stack_kernel,
        grid=(NUM_LAYERS,),
        in_specs=[
            pl.BlockSpec((B, S, H), const3),                 # x (embeddings after LN)
            pl.BlockSpec((B, S), const2),                    # additive attention bias
            pl.BlockSpec((None, H, 3 * H), per_layer),       # stacked Wqkv
            pl.BlockSpec((None, H, H), per_layer),           # stacked Wo
            pl.BlockSpec((None, H, FFN), per_layer),         # stacked W1
            pl.BlockSpec((None, FFN, H), per_layer),         # stacked W2
            pl.BlockSpec((None, PVEC_ROWS, FFN), per_layer),  # packed biases / LN params
            pl.BlockSpec((H, H), const2),                    # pooler weight
            pl.BlockSpec((H, CLS_PAD), const2),              # classifier weight (padded)
            pl.BlockSpec((2, CLS_PAD), const2),              # pooler_b / cls_b slab
        ],
        out_specs=pl.BlockSpec((B, CLS_PAD), const2),
        out_shape=jax.ShapeDtypeStruct((B, CLS_PAD), jnp.float32),
        scratch_shapes=[pltpu.VMEM((B * S, H), jnp.float32),   # activation carry
                        pltpu.VMEM((B * S, H), jnp.float32)],  # attention context
        compiler_params=pltpu.CompilerParams(
            dimension_semantics=("arbitrary",),              # sequential layer carry
            vmem_limit_bytes=32 * 1024 * 1024),
    )(x, bias, stacked["wqkv"], stacked["wo"], stacked["w1"], stacked["w2"],
      stacked["pvec"], pooler_w, cls_w_pad, head_bias)


# ------------------------- model glue (plain JAX) -------------------------

def init_params(key):
    def nrm(k, shape, std=0.02, dtype=jnp.float32):
        return (std * jax.random.normal(k, shape, jnp.float32)).astype(dtype)

    def pack_rows(rows, width=FFN):
        return jnp.stack([jnp.pad(r, (0, width - r.shape[0])) for r in rows])

    keys = jax.random.split(key, 6 + NUM_LAYERS)
    cls_w = nrm(keys[4], (HIDDEN, NUM_CLASSES))

    wqkv, wo, w1, w2, pvec = [], [], [], [], []
    zeros_h = jnp.zeros((HIDDEN,), jnp.float32)
    ones_h = jnp.ones((HIDDEN,), jnp.float32)
    for lyr in range(NUM_LAYERS):
        lk = jax.random.split(keys[6 + lyr], 4)
        wqkv.append(nrm(lk[0], (HIDDEN, 3 * HIDDEN), dtype=jnp.bfloat16))
        wo.append(nrm(lk[1], (HIDDEN, HIDDEN), dtype=jnp.bfloat16))
        w1.append(nrm(lk[2], (HIDDEN, FFN), dtype=jnp.bfloat16))
        w2.append(nrm(lk[3], (FFN, HIDDEN), dtype=jnp.bfloat16))
        pvec.append(pack_rows([
            jnp.zeros((3 * HIDDEN,), jnp.float32),   # row 0: bqkv
            jnp.zeros((FFN,), jnp.float32),          # row 1: b1
            zeros_h,                                 # row 2: bo
            ones_h, zeros_h,                         # rows 3,4: ln1 gamma/beta
            zeros_h,                                 # row 5: b2
            ones_h, zeros_h,                         # rows 6,7: ln2 gamma/beta
        ]))

    return {
        "word_emb": nrm(keys[0], (VOCAB, HIDDEN)),
        "pos_emb": nrm(keys[1], (MAX_POS, HIDDEN)),
        "type_emb": nrm(keys[2], (2, HIDDEN)),
        "emb_ln": jnp.stack([ones_h, zeros_h]),                       # (2, H): gamma, beta
        "pooler_w": nrm(keys[3], (HIDDEN, HIDDEN), dtype=jnp.bfloat16),
        # classifier weight padded 10 -> 128 columns (zeros); sliced outside.
        "cls_w_pad": jnp.pad(cls_w, ((0, 0), (0, CLS_PAD - NUM_CLASSES))
                             ).astype(jnp.bfloat16),
        "head_bias": jnp.zeros((2, CLS_PAD), jnp.float32),            # pooler_b, cls_b
        "stacked": {
            "wqkv": jnp.stack(wqkv), "wo": jnp.stack(wo),
            "w1": jnp.stack(w1), "w2": jnp.stack(w2),
            "pvec": jnp.stack(pvec),
        },
    }


def bert_classifier_forward(params, input_ids, mask):
    B, S = input_ids.shape
    # TODO(synk): embedding row-gather stays in plain JAX; token_type_ids assumed
    # all-zero (torch default when not provided); dropout(0.3) identity at inference.
    we = jnp.take(params["word_emb"], input_ids, axis=0)          # (B, S, H)
    pe = params["pos_emb"][:S][None, :, :]                        # (1, S, H)
    te = params["type_emb"][0][None, None, :]                     # (1, 1, H)
    x = embed_layernorm(we, pe, te, params["emb_ln"])             # (B, S, H) f32

    # attention_mask (1=keep, 0=pad) -> additive bias over keys
    bias = (1.0 - mask.astype(jnp.float32)) * -1e4                # (B, S)

    logits_padded = bert_encoder_and_head(
        x, bias, params["stacked"], params["pooler_w"],
        params["cls_w_pad"], params["head_bias"])                 # (B, CLS_PAD)
    return logits_padded[:, :NUM_CLASSES]


if __name__ == "__main__":
    key = jax.random.PRNGKey(0)
    pkey, ikey = jax.random.split(key)
    params = init_params(pkey)

    B, S = 2, 8
    input_ids = jax.random.randint(ikey, (B, S), 0, VOCAB, dtype=jnp.int32)
    mask = jnp.array([[1, 1, 1, 1, 1, 1, 1, 1],
                      [1, 1, 1, 1, 1, 1, 0, 0]], dtype=jnp.int32)

    out = jax.jit(bert_classifier_forward)(params, input_ids, mask)
    out = jax.block_until_ready(out)
    assert out.shape == (B, NUM_CLASSES)
    assert bool(jnp.all(jnp.isfinite(out)))
    assert bool(jnp.all(out >= 0.0))   # ReLU output
    print("KERNEL_OK")
</pallas_src>

<mosaic_0001>
module attributes {stable_mosaic.version = 11 : i64} {
  func.func @_embed_ln_kernel(%arg0: i32, %arg1: memref<2x8x128xf32, #tpu.memory_space<vmem>>, %arg2: memref<1x8x128xf32, #tpu.memory_space<vmem>>, %arg3: memref<1x1x128xf32, #tpu.memory_space<vmem>>, %arg4: memref<2x128xf32, #tpu.memory_space<vmem>>, %arg5: memref<2x8x128xf32, #tpu.memory_space<vmem>>) attributes {dimension_semantics = [#tpu.dimension_semantics<arbitrary>], iteration_bounds = array<i64: 1>, scalar_prefetch = 0 : i64, scratch_operands = 0 : i64, tpu.core_type = #tpu.core_type<tc>, window_params = [{pipeline_mode = #tpu.pipeline_mode<synchronous>, transform_indices = @transform_0, window_bounds = array<i64: 2, 8, 128>}, {pipeline_mode = #tpu.pipeline_mode<synchronous>, transform_indices = @transform_1, window_bounds = array<i64: 1, 8, 128>}, {pipeline_mode = #tpu.pipeline_mode<synchronous>, transform_indices = @transform_2, window_bounds = array<i64: 1, 1, 128>}, {pipeline_mode = #tpu.pipeline_mode<synchronous>, transform_indices = @transform_3, window_bounds = array<i64: 2, 128>}, {pipeline_mode = #tpu.pipeline_mode<synchronous>, transform_indices = @transform_4, window_bounds = array<i64: 2, 8, 128>}]} {
    %c0 = arith.constant 0 : index
    %c0_0 = arith.constant 0 : index
    %c0_1 = arith.constant 0 : index
    %0 = vector.load %arg1[%c0, %c0_0, %c0_1] : memref<2x8x128xf32, #tpu.memory_space<vmem>>, vector<2x8x128xf32>
    %c0_2 = arith.constant 0 : index
    %c0_3 = arith.constant 0 : index
    %c0_4 = arith.constant 0 : index
    %1 = vector.load %arg2[%c0_2, %c0_3, %c0_4] : memref<1x8x128xf32, #tpu.memory_space<vmem>>, vector<1x8x128xf32>
    %2 = vector.broadcast %1 : vector<1x8x128xf32> to vector<2x8x128xf32>
    %3 = arith.addf %0, %2 : vector<2x8x128xf32>
    %c0_5 = arith.constant 0 : index
    %c0_6 = arith.constant 0 : index
    %c0_7 = arith.constant 0 : index
    %4 = vector.load %arg3[%c0_5, %c0_6, %c0_7] : memref<1x1x128xf32, #tpu.memory_space<vmem>>, vector<1x1x128xf32>
    %5 = vector.broadcast %4 : vector<1x1x128xf32> to vector<2x8x128xf32>
    %6 = arith.addf %3, %5 : vector<2x8x128xf32>
    %7 = vector.shape_cast %6 : vector<2x8x128xf32> to vector<16x128xf32>
    %c0_8 = arith.constant 0 : index
    %c0_9 = arith.constant 0 : index
    %8 = vector.load %arg4[%c0_8, %c0_9] : memref<2x128xf32, #tpu.memory_space<vmem>>, vector<1x128xf32>
    %c1 = arith.constant 1 : index
    %c0_10 = arith.constant 0 : index
    %9 = vector.load %arg4[%c1, %c0_10] : memref<2x128xf32, #tpu.memory_space<vmem>>, vector<1x128xf32>
    %cst = arith.constant dense<0.000000e+00> : vector<16xf32>
    %10 = vector.multi_reduction <add>, %7, %cst [1] : vector<16x128xf32> to vector<16xf32>
    %11 = vector.shape_cast %10 : vector<16xf32> to vector<16x1xf32>
    %cst_11 = arith.constant 1.280000e+02 : f32
    %12 = vector.broadcast %cst_11 : f32 to vector<16x1xf32>
    %13 = arith.divf %11, %12 : vector<16x1xf32>
    %14 = vector.broadcast %13 : vector<16x1xf32> to vector<16x128xf32>
    %15 = arith.subf %7, %14 : vector<16x128xf32>
    %16 = arith.mulf %15, %15 : vector<16x128xf32>
    %cst_12 = arith.constant dense<0.000000e+00> : vector<16xf32>
    %17 = vector.multi_reduction <add>, %16, %cst_12 [1] : vector<16x128xf32> to vector<16xf32>
    %18 = vector.shape_cast %17 : vector<16xf32> to vector<16x1xf32>
    %cst_13 = arith.constant 1.280000e+02 : f32
    %19 = vector.broadcast %cst_13 : f32 to vector<16x1xf32>
    %20 = arith.divf %18, %19 : vector<16x1xf32>
    %21 = vector.broadcast %13 : vector<16x1xf32> to vector<16x128xf32>
    %22 = arith.subf %7, %21 : vector<16x128xf32>
    %cst_14 = arith.constant 9.99999996E-13 : f32
    %23 = vector.broadcast %cst_14 : f32 to vector<16x1xf32>
    %24 = arith.addf %20, %23 : vector<16x1xf32>
    %25 = math.rsqrt %24 : vector<16x1xf32>
    %26 = vector.broadcast %25 : vector<16x1xf32> to vector<16x128xf32>
    %27 = arith.mulf %22, %26 : vector<16x128xf32>
    %28 = vector.broadcast %8 : vector<1x128xf32> to vector<16x128xf32>
    %29 = arith.mulf %27, %28 : vector<16x128xf32>
    %30 = vector.broadcast %9 : vector<1x128xf32> to vector<16x128xf32>
    %31 = arith.addf %29, %30 : vector<16x128xf32>
    %32 = vector.shape_cast %31 : vector<16x128xf32> to vector<2x8x128xf32>
    %c0_15 = arith.constant 0 : index
    %c0_16 = arith.constant 0 : index
    %c0_17 = arith.constant 0 : index
    %33 = vector.load %arg5[%c0_15, %c0_16, %c0_17] : memref<2x8x128xf32, #tpu.memory_space<vmem>>, vector<2x8x128xf32>
    tpu.vector_store %arg5[%c0_15, %c0_16, %c0_17], %32 {strides = array<i32>} : memref<2x8x128xf32, #tpu.memory_space<vmem>>, vector<2x8x128xf32>,
    return
  }
  func.func @transform_0(%arg0: i32) -> (i32, i32, i32) {
    %c0_i32 = arith.constant 0 : i32
    %c0_i32_0 = arith.constant 0 : i32
    %c0_i32_1 = arith.constant 0 : i32
    %c0_i32_2 = arith.constant 0 : i32
    return %c0_i32, %c0_i32_0, %c0_i32_1 : i32, i32, i32
  }
  func.func @transform_1(%arg0: i32) -> (i32, i32, i32) {
    %c0_i32 = arith.constant 0 : i32
    %c0_i32_0 = arith.constant 0 : i32
    %c0_i32_1 = arith.constant 0 : i32
    %c0_i32_2 = arith.constant 0 : i32
    return %c0_i32, %c0_i32_0, %c0_i32_1 : i32, i32, i32
  }
  func.func @transform_2(%arg0: i32) -> (i32, i32, i32) {
    %c0_i32 = arith.constant 0 : i32
    %c0_i32_0 = arith.constant 0 : i32
    %c0_i32_1 = arith.constant 0 : i32
    %c0_i32_2 = arith.constant 0 : i32
    return %c0_i32, %c0_i32_0, %c0_i32_1 : i32, i32, i32
  }
  func.func @transform_3(%arg0: i32) -> (i32, i32) {
    %c0_i32 = arith.constant 0 : i32
    %c0_i32_0 = arith.constant 0 : i32
    %c0_i32_1 = arith.constant 0 : i32
    return %c0_i32, %c0_i32_0 : i32, i32
  }
  func.func @transform_4(%arg0: i32) -> (i32, i32, i32) {
    %c0_i32 = arith.constant 0 : i32
    %c0_i32_0 = arith.constant 0 : i32
    %c0_i32_1 = arith.constant 0 : i32
    %c0_i32_2 = arith.constant 0 : i32
    return %c0_i32, %c0_i32_0, %c0_i32_1 : i32, i32, i32
  }
}

module attributes {stable_mosaic.version = 11 : i64} {
  func.func @_bert_stack_kernel(%arg0: i32, %arg1: memref<2x8x128xf32, #tpu.memory_space<vmem>>, %arg2: memref<2x8xf32, #tpu.memory_space<vmem>>, %arg3: memref<1x128x384xbf16, #tpu.memory_space<vmem>>, %arg4: memref<1x128x128xbf16, #tpu.memory_space<vmem>>, %arg5: memref<1x128x512xbf16, #tpu.memory_space<vmem>>, %arg6: memref<1x512x128xbf16, #tpu.memory_space<vmem>>, %arg7: memref<1x8x512xf32, #tpu.memory_space<vmem>>, %arg8: memref<128x128xbf16, #tpu.memory_space<vmem>>, %arg9: memref<128x128xbf16, #tpu.memory_space<vmem>>, %arg10: memref<2x128xf32, #tpu.memory_space<vmem>>, %arg11: memref<2x128xf32, #tpu.memory_space<vmem>>, %arg12: memref<16x128xf32, #tpu.memory_space<vmem>>, %arg13: memref<16x128xf32, #tpu.memory_space<vmem>>) attributes {dimension_semantics = [#tpu.dimension_semantics<arbitrary>], iteration_bounds = array<i64: 2>, scalar_prefetch = 0 : i64, scratch_operands = 2 : i64, tpu.core_type = #tpu.core_type<tc>, window_params = [{pipeline_mode = #tpu.pipeline_mode<synchronous>, transform_indices = @transform_0, window_bounds = array<i64: 2, 8, 128>}, {pipeline_mode = #tpu.pipeline_mode<synchronous>, transform_indices = @transform_1, window_bounds = array<i64: 2, 8>}, {transform_indices = @transform_2, window_bounds = array<i64: 1, 128, 384>}, {transform_indices = @transform_3, window_bounds = array<i64: 1, 128, 128>}, {transform_indices = @transform_4, window_bounds = array<i64: 1, 128, 512>}, {transform_indices = @transform_5, window_bounds = array<i64: 1, 512, 128>}, {transform_indices = @transform_6, window_bounds = array<i64: 1, 8, 512>}, {pipeline_mode = #tpu.pipeline_mode<synchronous>, transform_indices = @transform_7, window_bounds = array<i64: 128, 128>}, {pipeline_mode = #tpu.pipeline_mode<synchronous>, transform_indices = @transform_8, window_bounds = array<i64: 128, 128>}, {pipeline_mode = #tpu.pipeline_mode<synchronous>, transform_indices = @transform_9, window_bounds = array<i64: 2, 128>}, {pipeline_mode = #tpu.pipeline_mode<synchronous>, transform_indices = @transform_10, window_bounds = array<i64: 2, 128>}]} {
    %c0_i32 = arith.constant 0 : i32
    %0 = arith.cmpi eq, %arg0, %c0_i32 : i32
    %1 = arith.extui %0 : i1 to i32
    %c0_i32_0 = arith.constant 0 : i32
    %2 = arith.cmpi ne, %1, %c0_i32_0 : i32
    scf.if %2 {
      %c0_66 = arith.constant 0 : index
      %c0_67 = arith.constant 0 : index
      %c0_68 = arith.constant 0 : index
      %211 = vector.load %arg1[%c0_66, %c0_67, %c0_68] : memref<2x8x128xf32, #tpu.memory_space<vmem>>, vector<2x8x128xf32>
      %212 = vector.shape_cast %211 : vector<2x8x128xf32> to vector<16x128xf32>
      %c0_69 = arith.constant 0 : index
      %c0_70 = arith.constant 0 : index
      %213 = vector.load %arg12[%c0_69, %c0_70] : memref<16x128xf32, #tpu.memory_space<vmem>>, vector<16x128xf32>
      tpu.vector_store %arg12[%c0_69, %c0_70], %212 {strides = array<i32>} : memref<16x128xf32, #tpu.memory_space<vmem>>, vector<16x128xf32>,
    } else {
    }
    %c0 = arith.constant 0 : index
    %c0_1 = arith.constant 0 : index
    %3 = vector.load %arg12[%c0, %c0_1] : memref<16x128xf32, #tpu.memory_space<vmem>>, vector<16x128xf32>
    %c0_2 = arith.constant 0 : index
    %c0_3 = arith.constant 0 : index
    %4 = vector.load %arg2[%c0_2, %c0_3] : memref<2x8xf32, #tpu.memory_space<vmem>>, vector<2x8xf32>
    %c0_4 = arith.constant 0 : index
    %c0_5 = arith.constant 0 : index
    %c0_6 = arith.constant 0 : index
    %5 = vector.load %arg7[%c0_4, %c0_5, %c0_6] : memref<1x8x512xf32, #tpu.memory_space<vmem>>, vector<1x8x512xf32>
    %6 = vector.shape_cast %5 : vector<1x8x512xf32> to vector<8x512xf32>
    %7 = vector.extract_strided_slice %6 {offsets = [0, 0], sizes = [1, 384], strides = [1, 1]} : vector<8x512xf32> to vector<1x384xf32>
    %8 = vector.extract_strided_slice %6 {offsets = [1, 0], sizes = [1, 512], strides = [1, 1]} : vector<8x512xf32> to vector<1x512xf32>
    %9 = vector.extract_strided_slice %6 {offsets = [2, 0], sizes = [1, 128], strides = [1, 1]} : vector<8x512xf32> to vector<1x128xf32>
    %10 = vector.extract_strided_slice %6 {offsets = [3, 0], sizes = [1, 128], strides = [1, 1]} : vector<8x512xf32> to vector<1x128xf32>
    %11 = vector.extract_strided_slice %6 {offsets = [4, 0], sizes = [1, 128], strides = [1, 1]} : vector<8x512xf32> to vector<1x128xf32>
    %12 = vector.extract_strided_slice %6 {offsets = [5, 0], sizes = [1, 128], strides = [1, 1]} : vector<8x512xf32> to vector<1x128xf32>
    %13 = vector.extract_strided_slice %6 {offsets = [6, 0], sizes = [1, 128], strides = [1, 1]} : vector<8x512xf32> to vector<1x128xf32>
    %14 = vector.extract_strided_slice %6 {offsets = [7, 0], sizes = [1, 128], strides = [1, 1]} : vector<8x512xf32> to vector<1x128xf32>
    %c0_7 = arith.constant 0 : index
    %c0_8 = arith.constant 0 : index
    %c0_9 = arith.constant 0 : index
    %15 = vector.load %arg3[%c0_7, %c0_8, %c0_9] : memref<1x128x384xbf16, #tpu.memory_space<vmem>>, vector<1x128x384xbf16>
    %16 = vector.shape_cast %15 : vector<1x128x384xbf16> to vector<128x384xbf16>
    %17 = arith.truncf %3 : vector<16x128xf32> to vector<16x128xbf16>
    %cst = arith.constant dense<0.000000e+00> : vector<16x384xf32>
    %18 = tpu.matmul %17, %16, %cst {dimension_numbers = #tpu.dot_dimension_numbers<[1], [0], [0], [1], [0, 0, 1, 1], [], []>} : vector<16x128xbf16>, vector<128x384xbf16>, vector<16x384xf32> -> vector<16x384xf32>
    %19 = vector.broadcast %7 : vector<1x384xf32> to vector<16x384xf32>
    %20 = arith.addf %18, %19 : vector<16x384xf32>
    %21 = vector.shape_cast %20 : vector<16x384xf32> to vector<2x8x384xf32>
    %22 = vector.extract_strided_slice %21 {offsets = [0, 0, 0], sizes = [2, 8, 128], strides = [1, 1, 1]} : vector<2x8x384xf32> to vector<2x8x128xf32>
    %23 = vector.extract_strided_slice %21 {offsets = [0, 0, 128], sizes = [2, 8, 128], strides = [1, 1, 1]} : vector<2x8x384xf32> to vector<2x8x128xf32>
    %24 = vector.extract_strided_slice %21 {offsets = [0, 0, 256], sizes = [2, 8, 128], strides = [1, 1, 1]} : vector<2x8x384xf32> to vector<2x8x128xf32>
    %25 = vector.extract_strided_slice %22 {offsets = [0, 0, 0], sizes = [2, 8, 32], strides = [1, 1, 1]} : vector<2x8x128xf32> to vector<2x8x32xf32>
    %26 = arith.truncf %25 : vector<2x8x32xf32> to vector<2x8x32xbf16>
    %27 = vector.extract_strided_slice %23 {offsets = [0, 0, 0], sizes = [2, 8, 32], strides = [1, 1, 1]} : vector<2x8x128xf32> to vector<2x8x32xf32>
    %28 = arith.truncf %27 : vector<2x8x32xf32> to vector<2x8x32xbf16>
    %29 = vector.extract_strided_slice %24 {offsets = [0, 0, 0], sizes = [2, 8, 32], strides = [1, 1, 1]} : vector<2x8x128xf32> to vector<2x8x32xf32>
    %30 = arith.truncf %29 : vector<2x8x32xf32> to vector<2x8x32xbf16>
    "tpu.trace_start"() <{level = 10 : i32, message = "bqd,bkd->bqk"}> : () -> ()
    %cst_10 = arith.constant dense<0.000000e+00> : vector<2x8x8xf32>
    %31 = tpu.matmul %26, %28, %cst_10 {dimension_numbers = #tpu.dot_dimension_numbers<[2], [2], [1], [1], [0, 0, 0, 1, 1, 1], [0], [0]>} : vector<2x8x32xbf16>, vector<2x8x32xbf16>, vector<2x8x8xf32> -> vector<2x8x8xf32>
    "tpu.trace_stop"() : () -> ()
    %cst_11 = arith.constant 0.176776692 : f32
    %32 = vector.broadcast %cst_11 : f32 to vector<2x8x8xf32>
    %33 = arith.mulf %31, %32 : vector<2x8x8xf32>
    %34 = vector.shape_cast %4 : vector<2x8xf32> to vector<2x1x8xf32>
    %35 = vector.broadcast %34 : vector<2x1x8xf32> to vector<2x8x8xf32>
    %36 = arith.addf %33, %35 : vector<2x8x8xf32>
    %cst_12 = arith.constant dense<0xFF800000> : vector<2x8xf32>
    %37 = vector.multi_reduction <maximumf>, %36, %cst_12 [2] : vector<2x8x8xf32> to vector<2x8xf32>
    %38 = vector.shape_cast %37 : vector<2x8xf32> to vector<2x8x1xf32>
    %39 = vector.broadcast %38 : vector<2x8x1xf32> to vector<2x8x8xf32>
    %40 = arith.subf %36, %39 : vector<2x8x8xf32>
    %41 = math.exp %40 : vector<2x8x8xf32>
    %cst_13 = arith.constant dense<0.000000e+00> : vector<2x8xf32>
    %42 = vector.multi_reduction <add>, %41, %cst_13 [2] : vector<2x8x8xf32> to vector<2x8xf32>
    %43 = vector.shape_cast %42 : vector<2x8xf32> to vector<2x8x1xf32>
    %44 = tpu.reciprocal %43 {approx = true} : vector<2x8x1xf32> -> vector<2x8x1xf32>
    %45 = vector.broadcast %44 : vector<2x8x1xf32> to vector<2x8x8xf32>
    %46 = arith.mulf %41, %45 : vector<2x8x8xf32>
    %47 = arith.truncf %46 : vector<2x8x8xf32> to vector<2x8x8xbf16>
    "tpu.trace_start"() <{level = 10 : i32, message = "bqk,bkd->bqd"}> : () -> ()
    %cst_14 = arith.constant dense<0.000000e+00> : vector<2x8x32xf32>
    %48 = tpu.matmul %47, %30, %cst_14 {dimension_numbers = #tpu.dot_dimension_numbers<[2], [1], [1], [2], [0, 0, 0, 1, 1, 2], [0], [0]>} : vector<2x8x8xbf16>, vector<2x8x32xbf16>, vector<2x8x32xf32> -> vector<2x8x32xf32>
    "tpu.trace_stop"() : () -> ()
    %49 = vector.shape_cast %48 : vector<2x8x32xf32> to vector<16x32xf32>
    %c0_15 = arith.constant 0 : index
    %c0_16 = arith.constant 0 : index
    %50 = vector.load %arg13[%c0_15, %c0_16] : memref<16x128xf32, #tpu.memory_space<vmem>>, vector<16x32xf32>
    tpu.vector_store %arg13[%c0_15, %c0_16], %49 {strides = array<i32>} : memref<16x128xf32, #tpu.memory_space<vmem>>, vector<16x32xf32>,
    %51 = vector.extract_strided_slice %22 {offsets = [0, 0, 32], sizes = [2, 8, 32], strides = [1, 1, 1]} : vector<2x8x128xf32> to vector<2x8x32xf32>
    %52 = arith.truncf %51 : vector<2x8x32xf32> to vector<2x8x32xbf16>
    %53 = vector.extract_strided_slice %23 {offsets = [0, 0, 32], sizes = [2, 8, 32], strides = [1, 1, 1]} : vector<2x8x128xf32> to vector<2x8x32xf32>
    %54 = arith.truncf %53 : vector<2x8x32xf32> to vector<2x8x32xbf16>
    %55 = vector.extract_strided_slice %24 {offsets = [0, 0, 32], sizes = [2, 8, 32], strides = [1, 1, 1]} : vector<2x8x128xf32> to vector<2x8x32xf32>
    %56 = arith.truncf %55 : vector<2x8x32xf32> to vector<2x8x32xbf16>
    "tpu.trace_start"() <{level = 10 : i32, message = "bqd,bkd->bqk"}> : () -> ()
    %cst_17 = arith.constant dense<0.000000e+00> : vector<2x8x8xf32>
    %57 = tpu.matmul %52, %54, %cst_17 {dimension_numbers = #tpu.dot_dimension_numbers<[2], [2], [1], [1], [0, 0, 0, 1, 1, 1], [0], [0]>} : vector<2x8x32xbf16>, vector<2x8x32xbf16>, vector<2x8x8xf32> -> vector<2x8x8xf32>
    "tpu.trace_stop"() : () -> ()
    %cst_18 = arith.constant 0.176776692 : f32
    %58 = vector.broadcast %cst_18 : f32 to vector<2x8x8xf32>
    %59 = arith.mulf %57, %58 : vector<2x8x8xf32>
    %60 = vector.shape_cast %4 : vector<2x8xf32> to vector<2x1x8xf32>
    %61 = vector.broadcast %60 : vector<2x1x8xf32> to vector<2x8x8xf32>
    %62 = arith.addf %59, %61 : vector<2x8x8xf32>
    %cst_19 = arith.constant dense<0xFF800000> : vector<2x8xf32>
    %63 = vector.multi_reduction <maximumf>, %62, %cst_19 [2] : vector<2x8x8xf32> to vector<2x8xf32>
    %64 = vector.shape_cast %63 : vector<2x8xf32> to vector<2x8x1xf32>
    %65 = vector.broadcast %64 : vector<2x8x1xf32> to vector<2x8x8xf32>
    %66 = arith.subf %62, %65 : vector<2x8x8xf32>
    %67 = math.exp %66 : vector<2x8x8xf32>
    %cst_20 = arith.constant dense<0.000000e+00> : vector<2x8xf32>
    %68 = vector.multi_reduction <add>, %67, %cst_20 [2] : vector<2x8x8xf32> to vector<2x8xf32>
    %69 = vector.shape_cast %68 : vector<2x8xf32> to vector<2x8x1xf32>
    %70 = tpu.reciprocal %69 {approx = true} : vector<2x8x1xf32> -> vector<2x8x1xf32>
    %71 = vector.broadcast %70 : vector<2x8x1xf32> to vector<2x8x8xf32>
    %72 = arith.mulf %67, %71 : vector<2x8x8xf32>
    %73 = arith.truncf %72 : vector<2x8x8xf32> to vector<2x8x8xbf16>
    "tpu.trace_start"() <{level = 10 : i32, message = "bqk,bkd->bqd"}> : () -> ()
    %cst_21 = arith.constant dense<0.000000e+00> : vector<2x8x32xf32>
    %74 = tpu.matmul %73, %56, %cst_21 {dimension_numbers = #tpu.dot_dimension_numbers<[2], [1], [1], [2], [0, 0, 0, 1, 1, 2], [0], [0]>} : vector<2x8x8xbf16>, vector<2x8x32xbf16>, vector<2x8x32xf32> -> vector<2x8x32xf32>
    "tpu.trace_stop"() : () -> ()
    %75 = vector.shape_cast %74 : vector<2x8x32xf32> to vector<16x32xf32>
    %c0_22 = arith.constant 0 : index
    %c32 = arith.constant 32 : index
    %76 = vector.load %arg13[%c0_22, %c32] : memref<16x128xf32, #tpu.memory_space<vmem>>, vector<16x32xf32>
    tpu.vector_store %arg13[%c0_22, %c32], %75 {strides = array<i32>} : memref<16x128xf32, #tpu.memory_space<vmem>>, vector<16x32xf32>,
    %77 = vector.extract_strided_slice %22 {offsets = [0, 0, 64], sizes = [2, 8, 32], strides = [1, 1, 1]} : vector<2x8x128xf32> to vector<2x8x32xf32>
    %78 = arith.truncf %77 : vector<2x8x32xf32> to vector<2x8x32xbf16>
    %79 = vector.extract_strided_slice %23 {offsets = [0, 0, 64], sizes = [2, 8, 32], strides = [1, 1, 1]} : vector<2x8x128xf32> to vector<2x8x32xf32>
    %80 = arith.truncf %79 : vector<2x8x32xf32> to vector<2x8x32xbf16>
    %81 = vector.extract_strided_slice %24 {offsets = [0, 0, 64], sizes = [2, 8, 32], strides = [1, 1, 1]} : vector<2x8x128xf32> to vector<2x8x32xf32>
    %82 = arith.truncf %81 : vector<2x8x32xf32> to vector<2x8x32xbf16>
    "tpu.trace_start"() <{level = 10 : i32, message = "bqd,bkd->bqk"}> : () -> ()
    %cst_23 = arith.constant dense<0.000000e+00> : vector<2x8x8xf32>
    %83 = tpu.matmul %78, %80, %cst_23 {dimension_numbers = #tpu.dot_dimension_numbers<[2], [2], [1], [1], [0, 0, 0, 1, 1, 1], [0], [0]>} : vector<2x8x32xbf16>, vector<2x8x32xbf16>, vector<2x8x8xf32> -> vector<2x8x8xf32>
    "tpu.trace_stop"() : () -> ()
    %cst_24 = arith.constant 0.176776692 : f32
    %84 = vector.broadcast %cst_24 : f32 to vector<2x8x8xf32>
    %85 = arith.mulf %83, %84 : vector<2x8x8xf32>
    %86 = vector.shape_cast %4 : vector<2x8xf32> to vector<2x1x8xf32>
    %87 = vector.broadcast %86 : vector<2x1x8xf32> to vector<2x8x8xf32>
    %88 = arith.addf %85, %87 : vector<2x8x8xf32>
    %cst_25 = arith.constant dense<0xFF800000> : vector<2x8xf32>
    %89 = vector.multi_reduction <maximumf>, %88, %cst_25 [2] : vector<2x8x8xf32> to vector<2x8xf32>
    %90 = vector.shape_cast %89 : vector<2x8xf32> to vector<2x8x1xf32>
    %91 = vector.broadcast %90 : vector<2x8x1xf32> to vector<2x8x8xf32>
    %92 = arith.subf %88, %91 : vector<2x8x8xf32>
    %93 = math.exp %92 : vector<2x8x8xf32>
    %cst_26 = arith.constant dense<0.000000e+00> : vector<2x8xf32>
    %94 = vector.multi_reduction <add>, %93, %cst_26 [2] : vector<2x8x8xf32> to vector<2x8xf32>
    %95 = vector.shape_cast %94 : vector<2x8xf32> to vector<2x8x1xf32>
    %96 = tpu.reciprocal %95 {approx = true} : vector<2x8x1xf32> -> vector<2x8x1xf32>
    %97 = vector.broadcast %96 : vector<2x8x1xf32> to vector<2x8x8xf32>
    %98 = arith.mulf %93, %97 : vector<2x8x8xf32>
    %99 = arith.truncf %98 : vector<2x8x8xf32> to vector<2x8x8xbf16>
    "tpu.trace_start"() <{level = 10 : i32, message = "bqk,bkd->bqd"}> : () -> ()
    %cst_27 = arith.constant dense<0.000000e+00> : vector<2x8x32xf32>
    %100 = tpu.matmul %99, %82, %cst_27 {dimension_numbers = #tpu.dot_dimension_numbers<[2], [1], [1], [2], [0, 0, 0, 1, 1, 2], [0], [0]>} : vector<2x8x8xbf16>, vector<2x8x32xbf16>, vector<2x8x32xf32> -> vector<2x8x32xf32>
    "tpu.trace_stop"() : () -> ()
    %101 = vector.shape_cast %100 : vector<2x8x32xf32> to vector<16x32xf32>
    %c0_28 = arith.constant 0 : index
    %c64 = arith.constant 64 : index
    %102 = vector.load %arg13[%c0_28, %c64] : memref<16x128xf32, #tpu.memory_space<vmem>>, vector<16x32xf32>
    tpu.vector_store %arg13[%c0_28, %c64], %101 {strides = array<i32>} : memref<16x128xf32, #tpu.memory_space<vmem>>, vector<16x32xf32>,
    %103 = vector.extract_strided_slice %22 {offsets = [0, 0, 96], sizes = [2, 8, 32], strides = [1, 1, 1]} : vector<2x8x128xf32> to vector<2x8x32xf32>
    %104 = arith.truncf %103 : vector<2x8x32xf32> to vector<2x8x32xbf16>
    %105 = vector.extract_strided_slice %23 {offsets = [0, 0, 96], sizes = [2, 8, 32], strides = [1, 1, 1]} : vector<2x8x128xf32> to vector<2x8x32xf32>
    %106 = arith.truncf %105 : vector<2x8x32xf32> to vector<2x8x32xbf16>
    %107 = vector.extract_strided_slice %24 {offsets = [0, 0, 96], sizes = [2, 8, 32], strides = [1, 1, 1]} : vector<2x8x128xf32> to vector<2x8x32xf32>
    %108 = arith.truncf %107 : vector<2x8x32xf32> to vector<2x8x32xbf16>
    "tpu.trace_start"() <{level = 10 : i32, message = "bqd,bkd->bqk"}> : () -> ()
    %cst_29 = arith.constant dense<0.000000e+00> : vector<2x8x8xf32>
    %109 = tpu.matmul %104, %106, %cst_29 {dimension_numbers = #tpu.dot_dimension_numbers<[2], [2], [1], [1], [0, 0, 0, 1, 1, 1], [0], [0]>} : vector<2x8x32xbf16>, vector<2x8x32xbf16>, vector<2x8x8xf32> -> vector<2x8x8xf32>
    "tpu.trace_stop"() : () -> ()
    %cst_30 = arith.constant 0.176776692 : f32
    %110 = vector.broadcast %cst_30 : f32 to vector<2x8x8xf32>
    %111 = arith.mulf %109, %110 : vector<2x8x8xf32>
    %112 = vector.shape_cast %4 : vector<2x8xf32> to vector<2x1x8xf32>
    %113 = vector.broadcast %112 : vector<2x1x8xf32> to vector<2x8x8xf32>
    %114 = arith.addf %111, %113 : vector<2x8x8xf32>
    %cst_31 = arith.constant dense<0xFF800000> : vector<2x8xf32>
    %115 = vector.multi_reduction <maximumf>, %114, %cst_31 [2] : vector<2x8x8xf32> to vector<2x8xf32>
    %116 = vector.shape_cast %115 : vector<2x8xf32> to vector<2x8x1xf32>
    %117 = vector.broadcast %116 : vector<2x8x1xf32> to vector<2x8x8xf32>
    %118 = arith.subf %114, %117 : vector<2x8x8xf32>
    %119 = math.exp %118 : vector<2x8x8xf32>
    %cst_32 = arith.constant dense<0.000000e+00> : vector<2x8xf32>
    %120 = vector.multi_reduction <add>, %119, %cst_32 [2] : vector<2x8x8xf32> to vector<2x8xf32>
    %121 = vector.shape_cast %120 : vector<2x8xf32> to vector<2x8x1xf32>
    %122 = tpu.reciprocal %121 {approx = true} : vector<2x8x1xf32> -> vector<2x8x1xf32>
    %123 = vector.broadcast %122 : vector<2x8x1xf32> to vector<2x8x8xf32>
    %124 = arith.mulf %119, %123 : vector<2x8x8xf32>
    %125 = arith.truncf %124 : vector<2x8x8xf32> to vector<2x8x8xbf16>
    "tpu.trace_start"() <{level = 10 : i32, message = "bqk,bkd->bqd"}> : () -> ()
    %cst_33 = arith.constant dense<0.000000e+00> : vector<2x8x32xf32>
    %126 = tpu.matmul %125, %108, %cst_33 {dimension_numbers = #tpu.dot_dimension_numbers<[2], [1], [1], [2], [0, 0, 0, 1, 1, 2], [0], [0]>} : vector<2x8x8xbf16>, vector<2x8x32xbf16>, vector<2x8x32xf32> -> vector<2x8x32xf32>
    "tpu.trace_stop"() : () -> ()
    %127 = vector.shape_cast %126 : vector<2x8x32xf32> to vector<16x32xf32>
    %c0_34 = arith.constant 0 : index
    %c96 = arith.constant 96 : index
    %128 = vector.load %arg13[%c0_34, %c96] : memref<16x128xf32, #tpu.memory_space<vmem>>, vector<16x32xf32>
    tpu.vector_store %arg13[%c0_34, %c96], %127 {strides = array<i32>} : memref<16x128xf32, #tpu.memory_space<vmem>>, vector<16x32xf32>,
    %c0_35 = arith.constant 0 : index
    %c0_36 = arith.constant 0 : index
    %129 = vector.load %arg13[%c0_35, %c0_36] : memref<16x128xf32, #tpu.memory_space<vmem>>, vector<16x128xf32>
    %c0_37 = arith.constant 0 : index
    %c0_38 = arith.constant 0 : index
    %c0_39 = arith.constant 0 : index
    %130 = vector.load %arg4[%c0_37, %c0_38, %c0_39] : memref<1x128x128xbf16, #tpu.memory_space<vmem>>, vector<1x128x128xbf16>
    %131 = vector.shape_cast %130 : vector<1x128x128xbf16> to vector<128x128xbf16>
    %132 = arith.truncf %129 : vector<16x128xf32> to vector<16x128xbf16>
    %cst_40 = arith.constant dense<0.000000e+00> : vector<16x128xf32>
    %133 = tpu.matmul %132, %131, %cst_40 {dimension_numbers = #tpu.dot_dimension_numbers<[1], [0], [0], [1], [0, 0, 1, 1], [], []>} : vector<16x128xbf16>, vector<128x128xbf16>, vector<16x128xf32> -> vector<16x128xf32>
    %134 = vector.broadcast %9 : vector<1x128xf32> to vector<16x128xf32>
    %135 = arith.addf %133, %134 : vector<16x128xf32>
    %136 = arith.addf %135, %3 : vector<16x128xf32>
    %cst_41 = arith.constant dense<0.000000e+00> : vector<16xf32>
    %137 = vector.multi_reduction <add>, %136, %cst_41 [1] : vector<16x128xf32> to vector<16xf32>
    %138 = vector.shape_cast %137 : vector<16xf32> to vector<16x1xf32>
    %cst_42 = arith.constant 1.280000e+02 : f32
    %139 = vector.broadcast %cst_42 : f32 to vector<16x1xf32>
    %140 = arith.divf %138, %139 : vector<16x1xf32>
    %141 = vector.broadcast %140 : vector<16x1xf32> to vector<16x128xf32>
    %142 = arith.subf %136, %141 : vector<16x128xf32>
    %143 = arith.mulf %142, %142 : vector<16x128xf32>
    %cst_43 = arith.constant dense<0.000000e+00> : vector<16xf32>
    %144 = vector.multi_reduction <add>, %143, %cst_43 [1] : vector<16x128xf32> to vector<16xf32>
    %145 = vector.shape_cast %144 : vector<16xf32> to vector<16x1xf32>
    %cst_44 = arith.constant 1.280000e+02 : f32
    %146 = vector.broadcast %cst_44 : f32 to vector<16x1xf32>
    %147 = arith.divf %145, %146 : vector<16x1xf32>
    %148 = vector.broadcast %140 : vector<16x1xf32> to vector<16x128xf32>
    %149 = arith.subf %136, %148 : vector<16x128xf32>
    %cst_45 = arith.constant 9.99999996E-13 : f32
    %150 = vector.broadcast %cst_45 : f32 to vector<16x1xf32>
    %151 = arith.addf %147, %150 : vector<16x1xf32>
    %152 = math.rsqrt %151 : vector<16x1xf32>
    %153 = vector.broadcast %152 : vector<16x1xf32> to vector<16x128xf32>
    %154 = arith.mulf %149, %153 : vector<16x128xf32>
    %155 = vector.broadcast %10 : vector<1x128xf32> to vector<16x128xf32>
    %156 = arith.mulf %154, %155 : vector<16x128xf32>
    %157 = vector.broadcast %11 : vector<1x128xf32> to vector<16x128xf32>
    %158 = arith.addf %156, %157 : vector<16x128xf32>
    %c0_46 = arith.constant 0 : index
    %c0_47 = arith.constant 0 : index
    %c0_48 = arith.constant 0 : index
    %159 = vector.load %arg5[%c0_46, %c0_47, %c0_48] : memref<1x128x512xbf16, #tpu.memory_space<vmem>>, vector<1x128x512xbf16>
    %160 = vector.shape_cast %159 : vector<1x128x512xbf16> to vector<128x512xbf16>
    %161 = arith.truncf %158 : vector<16x128xf32> to vector<16x128xbf16>
    %cst_49 = arith.constant dense<0.000000e+00> : vector<16x512xf32>
    %162 = tpu.matmul %161, %160, %cst_49 {dimension_numbers = #tpu.dot_dimension_numbers<[1], [0], [0], [1], [0, 0, 1, 1], [], []>} : vector<16x128xbf16>, vector<128x512xbf16>, vector<16x512xf32> -> vector<16x512xf32>
    %163 = vector.broadcast %8 : vector<1x512xf32> to vector<16x512xf32>
    %164 = arith.addf %162, %163 : vector<16x512xf32>
    %cst_50 = arith.constant 5.000000e-01 : f32
    %165 = vector.broadcast %cst_50 : f32 to vector<16x512xf32>
    %166 = arith.mulf %165, %164 : vector<16x512xf32>
    %cst_51 = arith.constant 4.471500e-02 : f32
    %167 = vector.broadcast %cst_51 : f32 to vector<16x512xf32>
    %168 = arith.mulf %167, %164 : vector<16x512xf32>
    %169 = arith.mulf %168, %164 : vector<16x512xf32>
    %170 = arith.mulf %169, %164 : vector<16x512xf32>
    %171 = arith.addf %164, %170 : vector<16x512xf32>
    %cst_52 = arith.constant 0.797884583 : f32
    %172 = vector.broadcast %cst_52 : f32 to vector<16x512xf32>
    %173 = arith.mulf %172, %171 : vector<16x512xf32>
    %174 = math.tanh %173 : vector<16x512xf32>
    %cst_53 = arith.constant 1.000000e+00 : f32
    %175 = vector.broadcast %cst_53 : f32 to vector<16x512xf32>
    %176 = arith.addf %175, %174 : vector<16x512xf32>
    %177 = arith.mulf %166, %176 : vector<16x512xf32>
    %c0_54 = arith.constant 0 : index
    %c0_55 = arith.constant 0 : index
    %c0_56 = arith.constant 0 : index
    %178 = vector.load %arg6[%c0_54, %c0_55, %c0_56] : memref<1x512x128xbf16, #tpu.memory_space<vmem>>, vector<1x512x128xbf16>
    %179 = vector.shape_cast %178 : vector<1x512x128xbf16> to vector<512x128xbf16>
    %180 = arith.truncf %177 : vector<16x512xf32> to vector<16x512xbf16>
    %cst_57 = arith.constant dense<0.000000e+00> : vector<16x128xf32>
    %181 = tpu.matmul %180, %179, %cst_57 {dimension_numbers = #tpu.dot_dimension_numbers<[1], [0], [0], [1], [0, 0, 1, 1], [], []>} : vector<16x512xbf16>, vector<512x128xbf16>, vector<16x128xf32> -> vector<16x128xf32>
    %182 = vector.broadcast %12 : vector<1x128xf32> to vector<16x128xf32>
    %183 = arith.addf %181, %182 : vector<16x128xf32>
    %184 = arith.addf %183, %158 : vector<16x128xf32>
    %cst_58 = arith.constant dense<0.000000e+00> : vector<16xf32>
    %185 = vector.multi_reduction <add>, %184, %cst_58 [1] : vector<16x128xf32> to vector<16xf32>
    %186 = vector.shape_cast %185 : vector<16xf32> to vector<16x1xf32>
    %cst_59 = arith.constant 1.280000e+02 : f32
    %187 = vector.broadcast %cst_59 : f32 to vector<16x1xf32>
    %188 = arith.divf %186, %187 : vector<16x1xf32>
    %189 = vector.broadcast %188 : vector<16x1xf32> to vector<16x128xf32>
    %190 = arith.subf %184, %189 : vector<16x128xf32>
    %191 = arith.mulf %190, %190 : vector<16x128xf32>
    %cst_60 = arith.constant dense<0.000000e+00> : vector<16xf32>
    %192 = vector.multi_reduction <add>, %191, %cst_60 [1] : vector<16x128xf32> to vector<16xf32>
    %193 = vector.shape_cast %192 : vector<16xf32> to vector<16x1xf32>
    %cst_61 = arith.constant 1.280000e+02 : f32
    %194 = vector.broadcast %cst_61 : f32 to vector<16x1xf32>
    %195 = arith.divf %193, %194 : vector<16x1xf32>
    %196 = vector.broadcast %188 : vector<16x1xf32> to vector<16x128xf32>
    %197 = arith.subf %184, %196 : vector<16x128xf32>
    %cst_62 = arith.constant 9.99999996E-13 : f32
    %198 = vector.broadcast %cst_62 : f32 to vector<16x1xf32>
    %199 = arith.addf %195, %198 : vector<16x1xf32>
    %200 = math.rsqrt %199 : vector<16x1xf32>
    %201 = vector.broadcast %200 : vector<16x1xf32> to vector<16x128xf32>
    %202 = arith.mulf %197, %201 : vector<16x128xf32>
    %203 = vector.broadcast %13 : vector<1x128xf32> to vector<16x128xf32>
    %204 = arith.mulf %202, %203 : vector<16x128xf32>
    %205 = vector.broadcast %14 : vector<1x128xf32> to vector<16x128xf32>
    %206 = arith.addf %204, %205 : vector<16x128xf32>
    %c0_63 = arith.constant 0 : index
    %c0_64 = arith.constant 0 : index
    %207 = vector.load %arg12[%c0_63, %c0_64] : memref<16x128xf32, #tpu.memory_space<vmem>>, vector<16x128xf32>
    tpu.vector_store %arg12[%c0_63, %c0_64], %206 {strides = array<i32>} : memref<16x128xf32, #tpu.memory_space<vmem>>, vector<16x128xf32>,
    %c1_i32 = arith.constant 1 : i32
    %208 = arith.cmpi eq, %arg0, %c1_i32 : i32
    %209 = arith.extui %208 : i1 to i32
    %c0_i32_65 = arith.constant 0 : i32
    %210 = arith.cmpi ne, %209, %c0_i32_65 : i32
    scf.if %210 {
      %211 = vector.shape_cast %206 : vector<16x128xf32> to vector<2x8x128xf32>
      %212 = vector.extract_strided_slice %211 {offsets = [0, 0, 0], sizes = [2, 1, 128], strides = [1, 1, 1]} : vector<2x8x128xf32> to vector<2x1x128xf32>
      %213 = vector.shape_cast %212 : vector<2x1x128xf32> to vector<2x128xf32>
      %c0_66 = arith.constant 0 : index
      %c0_67 = arith.constant 0 : index
      %214 = vector.load %arg8[%c0_66, %c0_67] : memref<128x128xbf16, #tpu.memory_space<vmem>>, vector<128x128xbf16>
      %c0_68 = arith.constant 0 : index
      %c0_69 = arith.constant 0 : index
      %215 = vector.load %arg10[%c0_68, %c0_69] : memref<2x128xf32, #tpu.memory_space<vmem>>, vector<1x128xf32>
      %216 = arith.truncf %213 : vector<2x128xf32> to vector<2x128xbf16>
      %cst_70 = arith.constant dense<0.000000e+00> : vector<2x128xf32>
      %217 = tpu.matmul %216, %214, %cst_70 {dimension_numbers = #tpu.dot_dimension_numbers<[1], [0], [0], [1], [0, 0, 1, 1], [], []>} : vector<2x128xbf16>, vector<128x128xbf16>, vector<2x128xf32> -> vector<2x128xf32>
      %218 = vector.broadcast %215 : vector<1x128xf32> to vector<2x128xf32>
      %219 = arith.addf %217, %218 : vector<2x128xf32>
      %220 = math.tanh %219 : vector<2x128xf32>
      %c0_71 = arith.constant 0 : index
      %c0_72 = arith.constant 0 : index
      %221 = vector.load %arg9[%c0_71, %c0_72] : memref<128x128xbf16, #tpu.memory_space<vmem>>, vector<128x128xbf16>
      %c1 = arith.constant 1 : index
      %c0_73 = arith.constant 0 : index
      %222 = vector.load %arg10[%c1, %c0_73] : memref<2x128xf32, #tpu.memory_space<vmem>>, vector<1x128xf32>
      %223 = arith.truncf %220 : vector<2x128xf32> to vector<2x128xbf16>
      %cst_74 = arith.constant dense<0.000000e+00> : vector<2x128xf32>
      %224 = tpu.matmul %223, %221, %cst_74 {dimension_numbers = #tpu.dot_dimension_numbers<[1], [0], [0], [1], [0, 0, 1, 1], [], []>} : vector<2x128xbf16>, vector<128x128xbf16>, vector<2x128xf32> -> vector<2x128xf32>
      %225 = vector.broadcast %222 : vector<1x128xf32> to vector<2x128xf32>
      %226 = arith.addf %224, %225 : vector<2x128xf32>
      %cst_75 = arith.constant 0.000000e+00 : f32
      %227 = vector.broadcast %cst_75 : f32 to vector<2x128xf32>
      %228 = arith.maximumf %226, %227 : vector<2x128xf32>
      %c0_76 = arith.constant 0 : index
      %c0_77 = arith.constant 0 : index
      %229 = vector.load %arg11[%c0_76, %c0_77] : memref<2x128xf32, #tpu.memory_space<vmem>>, vector<2x128xf32>
      tpu.vector_store %arg11[%c0_76, %c0_77], %228 {strides = array<i32>} : memref<2x128xf32, #tpu.memory_space<vmem>>, vector<2x128xf32>,
    } else {
    }
    return
  }
  func.func @transform_0(%arg0: i32) -> (i32, i32, i32) {
    %c0_i32 = arith.constant 0 : i32
    %c0_i32_0 = arith.constant 0 : i32
    %c0_i32_1 = arith.constant 0 : i32
    %c0_i32_2 = arith.constant 0 : i32
    return %c0_i32, %c0_i32_0, %c0_i32_1 : i32, i32, i32
  }
  func.func @transform_1(%arg0: i32) -> (i32, i32) {
    %c0_i32 = arith.constant 0 : i32
    %c0_i32_0 = arith.constant 0 : i32
    %c0_i32_1 = arith.constant 0 : i32
    return %c0_i32, %c0_i32_0 : i32, i32
  }
  func.func @transform_2(%arg0: i32) -> (i32, i32, i32) {
    %c0_i32 = arith.constant 0 : i32
    %c0_i32_0 = arith.constant 0 : i32
    %c0_i32_1 = arith.constant 0 : i32
    return %arg0, %c0_i32, %c0_i32_0 : i32, i32, i32
  }
  func.func @transform_3(%arg0: i32) -> (i32, i32, i32) {
    %c0_i32 = arith.constant 0 : i32
    %c0_i32_0 = arith.constant 0 : i32
    %c0_i32_1 = arith.constant 0 : i32
    return %arg0, %c0_i32, %c0_i32_0 : i32, i32, i32
  }
  func.func @transform_4(%arg0: i32) -> (i32, i32, i32) {
    %c0_i32 = arith.constant 0 : i32
    %c0_i32_0 = arith.constant 0 : i32
    %c0_i32_1 = arith.constant 0 : i32
    return %arg0, %c0_i32, %c0_i32_0 : i32, i32, i32
  }
  func.func @transform_5(%arg0: i32) -> (i32, i32, i32) {
    %c0_i32 = arith.constant 0 : i32
    %c0_i32_0 = arith.constant 0 : i32
    %c0_i32_1 = arith.constant 0 : i32
    return %arg0, %c0_i32, %c0_i32_0 : i32, i32, i32
  }
  func.func @transform_6(%arg0: i32) -> (i32, i32, i32) {
    %c0_i32 = arith.constant 0 : i32
    %c0_i32_0 = arith.constant 0 : i32
    %c0_i32_1 = arith.constant 0 : i32
    return %arg0, %c0_i32, %c0_i32_0 : i32, i32, i32
  }
  func.func @transform_7(%arg0: i32) -> (i32, i32) {
    %c0_i32 = arith.constant 0 : i32
    %c0_i32_0 = arith.constant 0 : i32
    %c0_i32_1 = arith.constant 0 : i32
    return %c0_i32, %c0_i32_0 : i32, i32
  }
  func.func @transform_8(%arg0: i32) -> (i32, i32) {
    %c0_i32 = arith.constant 0 : i32
    %c0_i32_0 = arith.constant 0 : i32
    %c0_i32_1 = arith.constant 0 : i32
    return %c0_i32, %c0_i32_0 : i32, i32
  }
  func.func @transform_9(%arg0: i32) -> (i32, i32) {
    %c0_i32 = arith.constant 0 : i32
    %c0_i32_0 = arith.constant 0 : i32
    %c0_i32_1 = arith.constant 0 : i32
    return %c0_i32, %c0_i32_0 : i32, i32
  }
  func.func @transform_10(%arg0: i32) -> (i32, i32) {
    %c0_i32 = arith.constant 0 : i32
    %c0_i32_0 = arith.constant 0 : i32
    %c0_i32_1 = arith.constant 0 : i32
    return %c0_i32, %c0_i32_0 : i32, i32
  }
}

</mosaic_0001>

<bundles_post_ra>
// kernel: bert_classifier_forward.2
= control target key start
LH: loop header
LB: loop body
LE: loop exit
PB: predicated region body
PF: predicated region fallthrough
CT: control target
= control target key end

     0   :  { %s130_s0 = inlined_call_operand.vmem [shape: f32[2,8,128], index: 0, kind: input, shape index: {}]   ;;  %s131_s1 = inlined_call_operand.vmem [shape: f32[1,8,128], index: 1, kind: input, shape index: {}]   ;;  %s132_s2 = inlined_call_operand.vmem [shape: f32[1,1,128], index: 2, kind: input, shape index: {}]   ;;  %s133_s3 = inlined_call_operand.vmem [shape: f32[2,128], index: 3, kind: input, shape index: {}]   ;;  %s134_s4 = inlined_call_operand.vmem [shape: f32[2,8,128], index: 4, kind: output, shape index: {}]  }
   0x1   :  { %v17_v0 = vld [vmem:[%s130_s0] sm:$0xff]  ;;  %v18_v4 = vld [vmem:[%s130_s0 + $0x8] sm:$0xff] }
   0x2   :  { %v19_v1 = vld [vmem:[%s131_s1] sm:$0xff] }
   0x3   :  { %v74_v2 = vld [vmem:[%s132_s2] ss:$0 sm:$0xff]  ;;  %v20_v3 = vadd.f32 %v19_v1, %v17_v0  ;;  %v21_v5 = vadd.f32 %v19_v1, %v18_v4  ;;  %v76_v25 = vld [vmem:[%s133_s3 + $0x1] ss:$0 sm:$0xff] }
   0x4   :  { %v75_v23 = vld [vmem:[%s133_s3] ss:$0 sm:$0xff] }
   0x5   :  { %v29_v6 = vadd.f32 %v74_v2, %v20_v3  ;;  %v30_v7 = vadd.f32 %v74_v2, %v21_v5 }
   0x7   :  { %33 = vadd.xlane.f32.xlu0 %v29_v6 }
   0xb   :  { %35 = vadd.xlane.f32.xlu0 %v30_v7 }
  0x90   :  { %v34_v8 = vpop.xlane.xlu0 %33 }
  0x91   :  { %v38_v9 = vmul.f32 0.0078125, %v34_v8 }
  0x93   :  { %v40_v10 = vsub.f32 %v29_v6, %v38_v9 }
  0x94   :  { %v36_v11 = vpop.xlane.xlu0 %35 }
  0x95   :  { %v39_v12 = vmul.f32 0.0078125, %v36_v11  ;;  %v42_v13 = vmul.f32 %v40_v10, %v40_v10 }
  0x97   :  { %v41_v14 = vsub.f32 %v30_v7, %v39_v12  ;;  %44 = vadd.xlane.f32.xlu1 %v42_v13 }
  0x99   :  { %v43_v15 = vmul.f32 %v41_v14, %v41_v14 }
  0x9b   :  { %46 = vadd.xlane.f32.xlu1 %v43_v15 }
 0x120   :  { %v45_v16 = vpop.xlane.xlu1 %44 }
 0x121   :  { %v48_v17 = vmul.f32 0.0078125, %v45_v16 }
 0x123   :  { %v50_v18 = vadd.f32 1e-12, %v48_v17 }
 0x124   :  { %v47_v19 = vpop.xlane.xlu1 %46 }
 0x125   :  { %77 = vrsqrt.f32 %v50_v18  ;;  %v49_v20 = vmul.f32 0.0078125, %v47_v19 }
 0x127   :  { %v51_v21 = vadd.f32 1e-12, %v49_v20 }
 0x129   :  { %79 = vrsqrt.f32 %v51_v21 }
 0x132   :  { %v78_v22 = vpop.eup %77 }
 0x133   :  { %v54_v24 = vmul.f32 %v78_v22, %v40_v10 }
 0x135   :  { %v60_v26 = vmul.f32 %v75_v23, %v54_v24 }
 0x136   :  { %v80_v27 = vpop.eup %79 }
 0x137   :  { %v66_v28 = vadd.f32 %v76_v25, %v60_v26  ;;  %v55_v29 = vmul.f32 %v80_v27, %v41_v14 }
 0x139   :  { %68 = vst [vmem:[%s134_s4] sm:$0xff] %v66_v28  ;;  %v61_v30 = vmul.f32 %v75_v23, %v55_v29 }
 0x13b   :  { %v67_v31 = vadd.f32 %v76_v25, %v61_v30 }
 0x13d   :  { %69 = vst [vmem:[%s134_s4 + $0x8] sm:$0xff] %v67_v31 }

// kernel: bert_classifier_forward.3
= control target key start
LH: loop header
LB: loop body
LE: loop exit
PB: predicated region body
PF: predicated region fallthrough
CT: control target
= control target key end

     0   :  { %s4659_s0 = inlined_call_operand.vmem [shape: f32[2,8,128], index: 0, kind: input, shape index: {}]   ;;  %s4660_s1 = inlined_call_operand.vmem [shape: f32[2,8], index: 1, kind: input, shape index: {}]   ;;  %s4661_s2 = inlined_call_operand.hbm [shape: bf16[2,128,384], index: 2, kind: input, shape index: {}]   ;;  %s4662_s3 = inlined_call_operand.vmem [shape: bf16[2,128,128], index: 3, kind: input, shape index: {}]   ;;  %s4663_s4 = inlined_call_operand.hbm [shape: bf16[2,128,512], index: 4, kind: input, shape index: {}]   ;;  %s4664_s5 = inlined_call_operand.hbm [shape: bf16[2,512,128], index: 5, kind: input, shape index: {}]   ;;  %s4665_s6 = inlined_call_operand.vmem [shape: f32[2,8,512], index: 6, kind: input, shape index: {}]   ;;  %s4666_s7 = inlined_call_operand.vmem [shape: bf16[128,128], index: 7, kind: input, shape index: {}]   ;;  %s4667_s8 = inlined_call_operand.hbm [shape: bf16[128,128], index: 8, kind: input, shape index: {}]   ;;  %s4668_s9 = inlined_call_operand.vmem [shape: f32[2,128], index: 9, kind: input, shape index: {}]   ;;  %s4669_s10 = inlined_call_operand.hbm [shape: f32[2,128], index: 10, kind: output, shape index: {}]  }
   0x1   :  { %4681 = sst [smem:[#allocation20_spill]] %s4659_s0 }
   0x2   :  { %4682 = sst [smem:[#allocation21_spill]] %s4660_s1 }
   0x3   :  { %4683 = sst [smem:[#allocation22_spill]] %s4663_s4 }
   0x4   :  { %4684 = sst [smem:[#allocation23_spill]] %s4666_s7 }
   0x5   :  { %4685 = sst [smem:[#allocation24_spill]] %s4668_s9 }
   0x6   :  { %4686 = sst [smem:[#allocation25_spill]] %s4669_s10 }
   0x7   :  { %15 = vsyncpa [#allocation5], 0 }
   0x8   :  { %17 = vsyncpa [#allocation5 + $0x1], 0 }
   0x9   :  { %18 = vsyncpa [#allocation8], 0 }
   0xa   :  { %20 = vsyncpa [#allocation8 + $0x1], 0 }
   0xb   :  { %21 = vsyncpa [#allocation11], 0 }
   0xc   :  { %22 = vsyncpa [#allocation6], 0  ;;  %s3998_s13 = smov 0   ;;  %s4000_s14 = smov 0  }
   0xd   :  { %s4002_s15 = smov 0   ;;  %s4004_s16 = smov 0  }
   0xe LB: > { %4687 = sst [smem:[#allocation17_spill]] %s3917_s15  ;;  %s4019_s17 = sadd.s32 1, %s3921_s16   ;;  %s3921_s16 = sphi %s4004_s16, %s4709_s16   ;;  %s3917_s15 = sphi %s4002_s15, %s4711_s15   ;;  %s3913_s14 = sphi %s4000_s14, %s4713_s14   ;;  %s3909_s13 = sphi %s3998_s13, %s4712_s13  }
   0xf   : > { %4688 = sst [smem:[#allocation18_spill]] %s4019_s17  ;;  %s77_s18 = sadd.s32 1, %s3917_s15 }
  0x10   : > { %s74_s19 = ssub.s32 %s3921_s16, %s4019_s17  ;;  %p84_p0 = scmp.ne.s32.totalorder %s3917_s15, %s3913_s14 }
  0x11   : > { %p75_p1 = scmp.eq.s32.totalorder %s74_s19, 0  ;;  %p85_p2 = scmp.eq.s32.totalorder %s3921_s16, 0 }
  0x12   : > { %p3489_p3 = scmp.lt.s32.totalorder %s3921_s16, 2  ;;  %s4032_s21 = sand.u32 1, %s3917_s15  }
  0x13   : > { %s4029_s20 = scalar_select %p75_p1, %s3917_s15, %s77_s18  }
  0x14   : > { %p86_p4 = por %p85_p2, %p84_p0  ;;  %s356_s22 = sand.u32 1, %s3921_s16  }
  0x15   : > { %4689 = sst [smem:[#allocation19_spill]] %s4029_s20  ;;  %s4670_s23 = sshll.u32 %s4032_s21, 8 }
  0x16   : > { %p4036_p5 = pnand %p3489_p3, %p86_p4  ;;  %s4671_s25 = sshll.u32 %s3921_s16, 12 }
  0x17   : > { %s4691_s4 = sld [smem:[#allocation22_spill]]  ;;  %s360_s29 = scalar_lea.vmem [#allocation7], %s4670_s23 }
  0x18   : > { %s367_s30 = sshll.u32 %s360_s29, 4  ;;  %s4052_s11 = scalar_lea.sflag [#allocation8], %s356_s22  ;;  %s4050_s30 = int_to_ptr.vmem [resolvable:$true] %s367_s30 }
  0x19   : > { %p4058_p7 = pneg %p4036_p5 }
  0x1d   : > { %s4046_s28 = scalar_lea.hbm %s4691_s4, %s4671_s25  ;;  %s3746_s27 = scalar_lea.hbm %s4691_s4, 8192 }
  0x1e   : > { %s3741_s12 = scalar_lea.hbm %s4046_s28, 4096  ;;  %p3747_p10 = scmp.lt.s32.totalorder %s4046_s28, %s4691_s4 }
  0x1f   : > { %p3742_p6 = scmp.ne.s32.totalorder %s4046_s28, %s3741_s12  ;;  %p3748_p11 = scmp.lt.s32.totalorder %s3746_s27, %s3741_s12 }
  0x21   : > { %p3744_p8 = pnand %p4058_p7, %p3742_p6  ;;  %p3749_p12 = por %p3748_p11, %p3747_p10 }
  0x23   : > { %p3745_p9 = pneg %p3744_p8 }
  0x25   : > { %p3750_p13 = pnand %p3749_p12, %p3745_p9 }
  0x27   : > { %3753 = shalt.err (!%p3750_p13)
}
  0x28   : > { %s3754_s22 = scalar_lea.vmem %s4050_s30, 4096  ;;  %s3923_s25 = smov [#allocation7]  }
  0x29   : > { %p3755_p0 = scmp.ne.s32.totalorder %s4050_s30, %s3754_s22  ;;  %s3759_s19 = sshll.u32 %s3923_s25, 4  ;;  %s3760_s19 = int_to_ptr.vmem [resolvable:$false] %s3759_s19 }
  0x2a   : > { %s3761_s26 = scalar_lea.vmem %s3760_s19, 8192  ;;  %p3762_p3 = scmp.lt.s32.totalorder %s4050_s30, %s3760_s19 }
  0x2b   : > { %p3757_p1 = pnand %p3755_p0, %p4058_p7  ;;  %p3763_p4 = scmp.lt.s32.totalorder %s3761_s26, %s3754_s22 }
  0x2d   : > { %p3758_p2 = pneg %p3757_p1  ;;  %p3764_p6 = por %p3763_p4, %p3762_p3 }
  0x2f   : > { %p3765_p8 = pnand %p3764_p6, %p3758_p2 }
  0x31   : > { %3768 = shalt.err (!%p3765_p8)
}
  0x32   : > { %s3924_s23 = smov 256   ;;  %s3925_s25 = smov 16  }
  0x33   : > { %3484 = dma.hbm_to_vmem [thread:$0]  (!%p4036_p5), %s4046_s28, 4096, %s4050_s30, %s4052_s11, %s3924_s23, %s3924_s23, %s3925_s25  }
  0x34   : > { %s4693_s12 = sshll.u32 %s3921_s16, 12  ;;  %s4694_s19 = sshll.u32 %s4032_s21, 8 }
  0x35   : > { %s4086_s22 = scalar_lea.hbm %s4664_s5, %s4693_s12  ;;  %s381_s26 = scalar_lea.vmem [#allocation9], %s4694_s19 }
  0x36   : > { %s388_s4 = sshll.u32 %s381_s26, 4  ;;  %s4093_s20 = sadd.s32 4294967295, %s3921_s16   ;;  %s4090_s4 = int_to_ptr.vmem [resolvable:$true] %s388_s4 }
  0x37   : > { %p90_p9 = scmp.ne.s32.totalorder %s3913_s14, %s3909_s13  ;;  %p4678_p10 = scmp.eq.s32.totalorder %s4093_s20, 0 }
  0x38   : > { %p3010_p11 = scmp.ge.s32.totalorder %s3921_s16, 1  ;;  %p289_p12 = scmp.lt.s32.totalorder %s3921_s16, 3 }
  0x39   : > { %p4103_p0 = por %p4678_p10, %p90_p9  ;;  %s3926_s23 = smov [#allocation10]  }
  0x3a   : > { %p4107_p1 = pnand %p3010_p11, %p289_p12  ;;  %s310_s25 = sshll.u32 %s3926_s23, 4  ;;  %s311_s25 = int_to_ptr.vmem [resolvable:$true] %s310_s25 }
  0x3b   : > { %s4695_s28 = scalar_select %p4103_p0, 1, 0 }
  0x3c   : > { %s4696_s30 = scalar_select %p4107_p1, 1, 0 }
  0x3d   : > { %p3474_p2 = pneg %p4107_p1  ;;  %s3457_s13 = smul.u32 192, %s4032_s21 }
  0x3e   : > { %s3458_s27 = smul.u32 3072, %s3921_s16  ;;  %s3780_s15 = scalar_lea.vmem %s311_s25, 1024 }
  0x3f   : > { %p4116_p3 = pnand %p3474_p2, %p4678_p10  ;;  %p3781_p6 = scmp.ne.s32.totalorder %s311_s25, %s3780_s15 }
  0x40   : > { %s4124_s26 = scalar_lea.hbm %s4661_s2, %s3458_s27  ;;  %p3788_p11 = scmp.lt.s32.totalorder %s311_s25, %s311_s25 }
  0x41   : > { %p3771_p4 = pneg %p4116_p3  ;;  %p3789_p12 = scmp.lt.s32.totalorder %s3780_s15, %s3780_s15 }
  0x43   : > { %p3783_p8 = pnand %p3781_p6, %p3771_p4  ;;  %p3790_p13 = por %p3789_p12, %p3788_p11 }
  0x45   : > { %p3784_p9 = pneg %p3783_p8 }
  0x47   : > { %p3791_p2 = pnand %p3790_p13, %p3784_p9 }
  0x49   : > { %3794 = shalt.err (!%p3791_p2)
}
  0x4a   : > { %s3927_s23 = smov 64   ;;  %s3928_s16 = smov 4  }
  0x4b   : > { %3477 = dma.hbm_to_vmem [thread:$0]  (!%p4116_p3), %s4667_s8, 1024, %s311_s25, [#allocation11], %s3927_s23, %s3927_s23, %s3928_s16  }
  0x4c   : > { %s331_s15 = scalar_lea.vmem [#allocation4], %s3457_s13  ;;  %s328_s17 = scalar_lea.sflag [#allocation5], %s4032_s21 }
  0x4d   : > { %s338_s19 = sshll.u32 %s331_s15, 4  ;;  %s3795_s10 = scalar_lea.hbm %s4124_s26, 3072  ;;  %s4136_s19 = int_to_ptr.vmem [resolvable:$true] %s338_s19 }
  0x4e   : > { %p3796_p13 = scmp.ne.s32.totalorder %s4124_s26, %s3795_s10  ;;  %s3800_s12 = scalar_lea.hbm %s4661_s2, 6144 }
  0x4f   : > { %p3801_p8 = scmp.lt.s32.totalorder %s4124_s26, %s4661_s2  ;;  %p3802_p9 = scmp.lt.s32.totalorder %s3800_s12, %s3795_s10 }
  0x50   : > { %p3798_p4 = pnand %p3796_p13, %p4058_p7 }
  0x51   : > { %p3803_p3 = por %p3802_p9, %p3801_p8 }
  0x52   : > { %p3799_p6 = pneg %p3798_p4 }
  0x54   : > { %p3804_p11 = pnand %p3803_p3, %p3799_p6 }
  0x56   : > { %3807 = shalt.err (!%p3804_p11)
}
  0x57   : > { %s3808_s25 = scalar_lea.vmem %s4136_s19, 3072  ;;  %s3929_s13 = smov [#allocation4]  }
  0x58   : > { %p3809_p12 = scmp.ne.s32.totalorder %s4136_s19, %s3808_s25  ;;  %s3813_s7 = sshll.u32 %s3929_s13, 4  ;;  %s3814_s7 = int_to_ptr.vmem [resolvable:$false] %s3813_s7 }
  0x59   : > { %s3815_s9 = scalar_lea.vmem %s3814_s7, 6144  ;;  %p3816_p4 = scmp.lt.s32.totalorder %s4136_s19, %s3814_s7 }
  0x5a   : > { %p3811_p2 = pnand %p3809_p12, %p4058_p7  ;;  %p3817_p10 = scmp.lt.s32.totalorder %s3815_s9, %s3808_s25 }
  0x5c   : > { %p3812_p13 = pneg %p3811_p2  ;;  %p3818_p0 = por %p3817_p10, %p3816_p4 }
  0x5e   : > { %p3819_p1 = pnand %p3818_p0, %p3812_p13 }
  0x60   : > { %3822 = shalt.err (!%p3819_p1)
}
  0x61   : > { %s3930_s0 = smov 192   ;;  %s3931_s1 = smov 12  }
  0x62   : > { %3481 = dma.hbm_to_vmem [thread:$0]  (!%p4036_p5), %s4124_s26, 3072, %s4136_s19, %s328_s17, %s3930_s0, %s3930_s0, %s3931_s1  }
  0x63   : > { %s3823_s10 = scalar_lea.hbm %s4086_s22, 4096  ;;  %s3828_s15 = scalar_lea.hbm %s4664_s5, 8192 }
  0x64   : > { %p3824_p6 = scmp.ne.s32.totalorder %s4086_s22, %s3823_s10  ;;  %p3829_p0 = scmp.lt.s32.totalorder %s4086_s22, %s4664_s5 }
  0x65   : > { %p3830_p1 = scmp.lt.s32.totalorder %s3828_s15, %s3823_s10 }
  0x66   : > { %p3826_p8 = pnand %p3824_p6, %p4058_p7 }
  0x67   : > { %p3831_p9 = por %p3830_p1, %p3829_p0 }
  0x68   : > { %p3827_p10 = pneg %p3826_p8 }
  0x6a   : > { %p3832_p3 = pnand %p3831_p9, %p3827_p10 }
  0x6c   : > { %3835 = shalt.err (!%p3832_p3)
}
  0x6d   : > { %s3836_s17 = scalar_lea.vmem %s4090_s4, 4096  ;;  %s3932_s21 = smov [#allocation9]  }
  0x6e   : > { %p3837_p11 = scmp.ne.s32.totalorder %s4090_s4, %s3836_s17  ;;  %s3841_s26 = sshll.u32 %s3932_s21, 4  ;;  %s3842_s26 = int_to_ptr.vmem [resolvable:$false] %s3841_s26 }
  0x6f   : > { %s3843_s19 = scalar_lea.vmem %s3842_s26, 8192  ;;  %p3844_p13 = scmp.lt.s32.totalorder %s4090_s4, %s3842_s26 }
  0x70   : > { %p3839_p12 = pnand %p3837_p11, %p4058_p7  ;;  %p3845_p4 = scmp.lt.s32.totalorder %s3843_s19, %s3836_s17 }
  0x72   : > { %p3840_p2 = pneg %p3839_p12  ;;  %p3846_p6 = por %p3845_p4, %p3844_p13 }
  0x74   : > { %p3847_p8 = pnand %p3846_p6, %p3840_p2 }
  0x76   : > { %3850 = shalt.err (!%p3847_p8)
}
  0x77   : > { %3487 = dma.hbm_to_vmem [thread:$0]  (!%p4036_p5), %s4086_s22, 4096, %s4090_s4, %s4052_s11, %s3927_s23, %s3927_s23, %s3928_s16  }
  0x78   : > { %p4698_p7 = scmp.ne.s32.totalorder %s4696_s30, 0 }
  0x79   : > { %s410_s18 = sand.u32 (!%p4698_p7), 1, %s3913_s14   ;;  %p4699_p10 = scmp.ne.s32.totalorder (!%p4698_p7), %s4695_s28, 0 }
  0x7a   : > { %408 = sbr.rel (%p4698_p7) target bundleno = 4544 (0x11c0), region = 60  ;;  %s411_s7 = scalar_lea.sflag (!%p4698_p7), [#allocation5], %s410_s18 }
  0x7b   : > { %s3459_s13 = smul.u32 (!%p4698_p7), 192, %s410_s18 }
  0x7d   : > { %s4188_s9 = scalar_lea.vmem (!%p4698_p7), [#allocation4], %s3459_s13 }
  0x7f   : > { %3892 = dma.done.wait (%p4699_p10), %s411_s7, 3072  }
  0x80   : > { %3894 = vsyncadd (%p4699_p10), %s411_s7, 4294964224  ;;  %s419_s24 = sand.u32 1, %s4093_s20   ;;  %s3021_s0 = sshll.u32 %s410_s18, 8 }
  0x81   : > { %s420_s4 = scalar_lea.sflag [#allocation8], %s419_s24  ;;  %s4195_s11 = scalar_lea.vmem [#allocation7], %s3021_s0 }
  0x82   : > { %3896 = dma.done.wait (%p4699_p10), %s420_s4, 8192  }
  0x83   : > { %3898 = vsyncadd (%p4699_p10), %s420_s4, 4294959104  ;;  %s4201_s22 = scalar_lea.vmem [#allocation9], %s3021_s0  ;;  %p4700_p5 = scmp.eq.s32.totalorder %s4093_s20, 0 }
  0x85   : > { %3900 = dma.done.wait (%p4700_p5), [#allocation11], 1024   ;;  %p4701_p0 = pmov %p4700_p5 }
  0x86   : > { %p488_p1 = scmp.lt.s32.totalorder %s4093_s20, 1  ;;  %p4702_p9 = scmp.ne.s32.totalorder %s4093_s20, 0 }
  0x87   : > { %3902 = vsyncadd (%p4701_p0), [#allocation11], 4294966272  ;;  %s4703_s17 = sld [smem:[#allocation20_spill]] (!%p4702_p9) }
  0x88   : > { %s489_s30 = scalar_select %p488_p1, %s4093_s20, 1 }
  0x89   : > { %502 = sbr.rel (%p4702_p9) target bundleno = 144 (0x90), region = 80 }
  0x8a   : > { %s3167_s23 = sshll.u32 %s489_s30, 6  ;;  %s3168_s16 = sshll.u32 %s489_s30, 5 }
  0x8b   : > { %s4212_s27 = scalar_lea.vmem %s4662_s3, %s3167_s23  ;;  %s4217_s15 = scalar_lea.vmem %s4665_s6, %s3168_s16 }
  0x8e   : > { %v503_v0 = vld [vmem:[%s4703_s17] sm:$0xff]  ;;  %v504_v1 = vld [vmem:[%s4703_s17 + $0x8] sm:$0xff] }
  0x8f   : > { %505 = vst [vmem:[#allocation2] sm:$0xff] %v503_v0  ;;  %506 = vst [vmem:[#allocation2 + $0x8] sm:$0xff] %v504_v1 }
  0x90 PF: > { %v3542_v2 = vld [vmem:[%s4188_s9 + $0xac] ss:$12 sps:$4 sm:$0xff]   ;;  %v3544_v3 = vld [vmem:[%s4188_s9 + $0xa8] ss:$12 sps:$4 sm:$0xff]   ;;  %v3933_v4 = vmov 0   ;;  %v3934_v5 = vmov 0.0   ;;  %v547_v31 = vlaneseq }
  0x91   : > { %719 = vmatprep.mubr.bf16.mxu0 %v3933_v4  ;;  %3281 = vmatprep.subr.bf16.mxu1 %v3934_v5  ;;  %v3545_v6 = vld [vmem:[%s4188_s9 + $0x94] ss:$12 sps:$4 sm:$0xff]   ;;  %v3547_v7 = vld [vmem:[%s4188_s9 + $0x90] ss:$12 sps:$4 sm:$0xff]   ;;  %v3550_v9 = vld [vmem:[%s4188_s9 + $0x78] ss:$12 sps:$4 sm:$0xff]  }
  0x92   : > { %687 = vmatprep.subr.bf16.mxu0 %v3542_v2  ;;  %v3548_v8 = vld [vmem:[%s4188_s9 + $0x7c] ss:$12 sps:$4 sm:$0xff]   ;;  %v3551_v10 = vld [vmem:[%s4188_s9 + $0x64] ss:$12 sps:$4 sm:$0xff]   ;;  %v3553_v11 = vld [vmem:[%s4188_s9 + $0x60] ss:$12 sps:$4 sm:$0xff]  }
  0x93   : > { %688 = vmatpush1.bf16.msra.mxu0 %v3544_v3  ;;  %v3554_v12 = vld [vmem:[%s4188_s9 + $0x4c] ss:$12 sps:$4 sm:$0xff]   ;;  %v3566_v13 = vld [vmem:[%s4188_s9 + $0xb0] ss:$12 sps:$4 sm:$0xff]   ;;  %v3556_v15 = vld [vmem:[%s4188_s9 + $0x48] ss:$12 sps:$4 sm:$0xff]  }
  0x94   : > { %689 = vmatprep.subr.bf16.mxu0 %v3545_v6  ;;  %3282 = vmatpush3.bf16.msra.mxu1 %v3566_v13  ;;  %v3567_v14 = vld [vmem:[%s4188_s9 + $0x98] ss:$12 sps:$4 sm:$0xff]   ;;  %v3557_v16 = vld [vmem:[%s4188_s9 + $0x34] ss:$12 sps:$4 sm:$0xff]   ;;  %v3559_v18 = vld [vmem:[%s4188_s9 + $0x30] ss:$12 sps:$4 sm:$0xff]  }
  0x95   : > { %3283 = vmatprep.subr.bf16.mxu1 %v3934_v5  ;;  %v3568_v17 = vld [vmem:[%s4188_s9 + $0x80] ss:$12 sps:$4 sm:$0xff]   ;;  %v3560_v19 = vld [vmem:[%s4188_s9 + $0x1c] ss:$12 sps:$4 sm:$0xff]   ;;  %v3562_v21 = vld [vmem:[%s4188_s9 + $0x18] ss:$12 sps:$4 sm:$0xff]  }
  0x96   : > { %v3569_v20 = vld [vmem:[%s4188_s9 + $0x68] ss:$12 sps:$4 sm:$0xff]   ;;  %v3563_v22 = vld [vmem:[%s4188_s9 + $0x4] ss:$12 sps:$4 sm:$0xff]   ;;  %v3565_v24 = vld [vmem:[%s4188_s9] ss:$12 sps:$4 sm:$0xff]  }
  0x97   : > { %690 = vmatpush1.bf16.msra.mxu0 %v3547_v7  ;;  %v3570_v23 = vld [vmem:[%s4188_s9 + $0x50] ss:$12 sps:$4 sm:$0xff]   ;;  %v507_v25 = vld [vmem:[#allocation2] sm:$0xff]  ;;  %v508_v26 = vld [vmem:[#allocation2 + $0x8] sm:$0xff]  ;;  %vm3935_vm0 = vmmov 0   ;;  %v4268_v32 = vshrl.u32 %v547_v31, 7 }
  0x98   : > { %691 = vmatprep.subr.bf16.mxu0 %v3548_v8  ;;  %3284 = vmatpush3.bf16.msra.mxu1 %v3567_v14  ;;  %v3571_v27 = vld [vmem:[%s4188_s9 + $0x38] ss:$12 sps:$4 sm:$0xff]   ;;  %v546_v28 = vpack.c.bf16 %v508_v26, %v507_v25  ;;  %v3572_v29 = vld [vmem:[%s4188_s9 + $0x20] ss:$12 sps:$4 sm:$0xff]   ;;  %v3573_v30 = vld [vmem:[%s4188_s9 + $0x8] ss:$12 sps:$4 sm:$0xff]  }
  0x99   : > { %3285 = vmatprep.subr.bf16.mxu1 %v3934_v5  ;;  %3297 = vmatprep.mubr.msk.bf16.mxu1 %vm3935_vm0, %v3934_v5  ;;  %v511_v33 = vld [vmem:[%s4217_s15 + $0x8] sm:$0xff]  ;;  %v549_v34 = vsub.s32 0, %v4268_v32  ;;  %v4273_v37 = vld [vmem:[%s4217_s15] sm:$0xff]  ;;  %vm777_vm1 = vcmask 261120   ;;  %v512_v52 = vld [vmem:[%s4217_s15 + $0x10] sm:$0xff]  ;;  %vm935_vm2 = vcmask 1043456  }
  0x9a   : > { %v3936_v62 = vmov 1966171168   ;;  %s4704_s13 = sld [smem:[#allocation21_spill]]  ;;  %vm907_vm3 = vcmask 64512   ;;  %s3937_s7 = smov 96   ;;  %vm1265_vm4 = vcmask 523520  }
  0x9b   : > { %692 = vmatpush1.bf16.msra.mxu0 %v3550_v9  ;;  %v554_v35 = vrot.slane %v511_v33, %v549_v34  ;;  %v550_v41 = vrot.slane %v4273_v37, %v549_v34  ;;  %v558_v53 = vrot.slane %v512_v52, %v549_v34  ;;  %v882_v63 = vunpack.c.l.s4 %v3936_v62  ;;  %s3938_s9 = smov 64   ;;  %s3939_s24 = smov 32  }
  0x9c   : > { %693 = vmatprep.subr.bf16.mxu0 %v3551_v10  ;;  %3286 = vmatpush3.bf16.msra.mxu1 %v3568_v17  ;;  %vm1500_vm5 = vcmask 785920   ;;  %vm1735_vm6 = vcmask 1048320   ;;  %p3142_p3 = scmp.ne.s32.totalorder %s4093_s20, 1 }
  0x9d   : > { %3287 = vmatprep.subr.bf16.mxu1 %v3934_v5  ;;  %v883_v0 = vunpack.c.0.s8 %v882_v63 }
  0x9f   : > { %694 = vmatpush1.bf16.msra.mxu0 %v3553_v11  ;;  %v886_v1 = vsub.s32 %v883_v0, %v4268_v32 }
  0xa0   : > { %695 = vmatprep.subr.bf16.mxu0 %v3554_v12  ;;  %3288 = vmatpush3.bf16.msra.mxu1 %v3569_v20  ;;  %v3055_v2 = vld.sshfl [vmem:[%s4704_s13] sm:$0x11 pattern:$0x75316420]  ;;  %s4706_s13 = sld [smem:[#allocation24_spill]] (!%p3142_p3) }
  0xa1   : > { %3289 = vmatprep.subr.bf16.mxu1 %v3934_v5  ;;  %v887_v3 = vrot.slane %v3055_v2, %v886_v1  ;;  %v880_v6 = vcombine.high %v3055_v2, %v3055_v2 }
  0xa3   : > { %696 = vmatpush1.bf16.msra.mxu0 %v3556_v15  ;;  %v4308_v7 = vrot.slane %v887_v3, %v549_v34  ;;  %v894_v12 = vrot.slane %v880_v6, %v886_v1 }
  0xa4   : > { %697 = vmatprep.subr.bf16.mxu0 %v3557_v16  ;;  %3290 = vmatpush3.bf16.msra.mxu1 %v3570_v23 }
  0xa5   : > { %3291 = vmatprep.subr.bf16.mxu1 %v3934_v5  ;;  %v4312_v16 = vrot.slane %v894_v12, %v549_v34 }
  0xa7   : > { %698 = vmatpush1.bf16.msra.mxu0 %v3559_v18 }
  0xa8   : > { %699 = vmatprep.subr.bf16.mxu0 %v3560_v19  ;;  %3292 = vmatpush3.bf16.msra.mxu1 %v3571_v27 }
  0xa9   : > { %3293 = vmatprep.subr.bf16.mxu1 %v3934_v5 }
  0xab   : > { %700 = vmatpush1.bf16.msra.mxu0 %v3562_v21 }
  0xac   : > { %701 = vmatprep.subr.bf16.mxu0 %v3563_v22  ;;  %3294 = vmatpush3.bf16.msra.mxu1 %v3572_v29 }
  0xad   : > { %3295 = vmatprep.subr.bf16.mxu1 %v3934_v5 }
  0xaf   : > { %702 = vmatpush1.bf16.msra.mxu0 %v3565_v24 }
  0xb0   : > { %3325 = vmatprep.subr.bf16.mxu0 %v3934_v5  ;;  %3296 = vmatpush3.bf16.msra.mxu1 %v3573_v30 }
  0xb1   : > { %3301 = vmatprep.subr.bf16.mxu1 %v3934_v5 }
  0xb2   : > { %720 = vmatmul.mubr.bf16.vlgmr.msra.gmra.mxu0 %v546_v28 }
  0xb3   : > { %3327 = vmatprep.mubr.msk.bf16.mxu0 %vm3935_vm0, %v3934_v5  ;;  %3298 = vmatmul.mubr.bf16.vlgmr.msra.gmra.mxu1 %v546_v28 }
  0xb4   : > { %3303 = vmatprep.mubr.msk.bf16.mxu1 %vm3935_vm0, %v3934_v5 }
 0x172   : > { %v721_v36 = vpop.f32.mrf.mxu0 }
 0x173   : > { %v722_v46 = vadd.f32 %v721_v36, %v550_v41  ;;  %v764_v54 = vpop.f32.mrf.mxu1 }
 0x174   : > { %v723_v38 = vpop.f32.mrf.mxu0  ;;  %v765_v55 = vadd.f32 %v764_v54, %v558_v53 }
 0x175   : > { %v724_v39 = vadd.f32 %v723_v38, %v554_v35  ;;  %v4283_v48 = vpack.c.bf16 %v722_v46, %v722_v46  ;;  %v3299_v56 = vpop.f32.mrf.mxu1 }
 0x176   : > { %v725_v40 = vpop.f32.mrf.mxu0  ;;  %v4299_v57 = vpack.c.bf16 %v765_v55, %v765_v55 }
 0x177   : > { %v4276_v42 = vpack.c.bf16 %v724_v39, %v724_v39  ;;  %v726_v50 = vadd.f32 %v725_v40, %v550_v41  ;;  %v767_v58 = vpop.f32.mrf.mxu1 }
 0x178   : > { %v727_v43 = vpop.f32.mrf.mxu0  ;;  %v768_v59 = vadd.f32 %v767_v58, %v558_v53  ;;  %v937_v60 = vsel %vm935_vm2, %v4299_v57, 0 }
 0x179   : > { %v728_v44 = vadd.f32 %v727_v43, %v554_v35  ;;  %v782_v45 = vsel %vm777_vm1, %v4276_v42, 0  ;;  %v4292_v51 = vpack.c.bf16 %v726_v50, %v726_v50  ;;  %v3300_v61 = vpop.f32.mrf.mxu1 }
 0x17a   : > { %3302 = vmatpush3.bf16.xpose.msra.mxu1 %v782_v45  ;;  %v4328_v40 = vpack.c.bf16 %v768_v59, %v768_v59 }
 0x17b   : > { %3307 = vmatprep.subr.bf16.mxu1 %v3934_v5  ;;  %v4281_v47 = vpack.c.bf16 %v728_v44, %v728_v44 }
 0x17c   : > { %v983_v44 = vsel %vm935_vm2, %v4328_v40, 0 }
 0x17d   : > { %v828_v49 = vsel %vm777_vm1, %v4281_v47, 0 }
 0x181   : > { %3304 = vmatmul.mubr.msk.bf16.vlgmr.msra.gmra.mxu1 %vm777_vm1, %v4283_v48 }
 0x182   : > { %3308 = vmatpush3.bf16.xpose.msra.mxu1 %v828_v49  ;;  %3309 = vmatprep.mubr.msk.bf16.mxu1 %vm3935_vm0, %v3934_v5 }
 0x183   : > { %3313 = vmatprep.subr.bf16.mxu1 %v3934_v5 }
 0x189   : > { %3310 = vmatmul.mubr.msk.bf16.vlgmr.msra.gmra.mxu1 %vm777_vm1, %v4292_v51 }
 0x18a   : > { %3315 = vmatprep.mubr.msk.bf16.mxu1 %vm3935_vm0, %v3934_v5  ;;  %3314 = vmatpush3.bf16.msra.mxu1 %v937_v60 }
 0x18b   : > { %3319 = vmatprep.subr.bf16.mxu1 %v3934_v5 }
 0x241   : > { %v818_v8 = vpop.f32.mrf.mxu1 }
 0x242   : > { %v870_v9 = vmul.f32 0.17677669, %v818_v8 }
 0x243   : > { %v3305_v10 = vpop.f32.mrf.mxu1 }
 0x244   : > { %v905_v11 = vadd.f32 %v4308_v7, %v870_v9 }
 0x245   : > { %v821_v13 = vpop.f32.mrf.mxu1 }
 0x246   : > { %v908_v14 = vsel %vm907_vm3, %v905_v11, -inf }
 0x247   : > { %909 = vmax.xlane.f32.xlu0 %v908_v14  ;;  %v3306_v15 = vpop.f32.mrf.mxu1 }
 0x249   : > { %v864_v17 = vpop.f32.mrf.mxu1 }
 0x24a   : > { %v871_v18 = vmul.f32 0.17677669, %v864_v17 }
 0x24b   : > { %v3311_v19 = vpop.f32.mrf.mxu1 }
 0x24c   : > { %v906_v20 = vadd.f32 %v4312_v16, %v871_v18 }
 0x24d   : > { %v867_v21 = vpop.f32.mrf.mxu1 }
 0x24e   : > { %v911_v22 = vsel %vm907_vm3, %v906_v20, -inf }
 0x24f   : > { %912 = vmax.xlane.f32.xlu0 %v911_v22  ;;  %v3312_v23 = vpop.f32.mrf.mxu1 }
 0x265   : > { %1031 = vrot.lane.b32.xlu0 %v4276_v42, %s3937_s7 }
 0x2d0   : > { %v910_v24 = vpop.xlane.xlu0 %909 }
 0x2d1   : > { %v914_v25 = vsub.f32 %v905_v11, %v910_v24 }
 0x2d3   : > { %v916_v26 = vmul.f32 1.442695, %v914_v25 }
 0x2d5   : > { %3662 = vpow2.f32 %v916_v26 }
 0x2d8   : > { %v913_v27 = vpop.xlane.xlu0 %912 }
 0x2d9   : > { %v915_v33 = vsub.f32 %v906_v20, %v913_v27 }
 0x2db   : > { %v918_v34 = vmul.f32 1.442695, %v915_v33 }
 0x2dc   : > { %v1032_v28 = vpop.permute.xlu0 %1031 }
 0x2dd   : > { %v1037_v29 = vsel %vm777_vm1, %v1032_v28, 0  ;;  %3664 = vpow2.f32 %v918_v34 }
 0x2de   : > { %3326 = vmatpush3.bf16.xpose.msra.mxu0 %v1037_v29 }
 0x2df   : > { %3337 = vmatprep.subr.bf16.mxu0 %v3934_v5 }
 0x2e2   : > { %v3663_v30 = vpop.eup %3662 }
 0x2e3   : > { %v920_v31 = vsel %vm907_vm3, %v3663_v30, 0.0 }
 0x2e4   : > { %921 = vadd.xlane.f32.xlu1 %v920_v31 }
 0x2ea   : > { %v3665_v35 = vpop.eup %3664 }
 0x2eb   : > { %v923_v36 = vsel %vm907_vm3, %v3665_v35, 0.0 }
 0x2f5   : > { %1083 = vrot.lane.b32.xlu1 %v4281_v47, %s3937_s7 }
 0x319   : > { %924 = vadd.xlane.f32.xlu1 %v923_v36 }
 0x32a   : > { %1028 = vrot.lane.b32.xlu1 %v4283_v48, %s3937_s7 }
 0x32e   : > { %1080 = vrot.lane.b32.xlu1 %v4292_v51, %s3937_s7 }
 0x36d   : > { %v922_v38 = vpop.xlane.xlu1 %921 }
 0x36e   : > { %3666 = vrcp.f32 %v922_v38 }
 0x371   : > { %v1084_v45 = vpop.permute.xlu1 %1083 }
 0x372   : > { %v1089_v54 = vsel %vm777_vm1, %v1084_v45, 0 }
 0x37b   : > { %v3667_v39 = vpop.eup %3666 }
 0x37c   : > { %v928_v41 = vmul.f32 %v3667_v39, %v3663_v30 }
 0x37e   : > { %v930_v43 = vpack.c.bf16 %v928_v41, %v928_v41 }
 0x380   : > { %3316 = vmatmul.mubr.msk.bf16.vlgmr.msra.gmra.mxu1 %vm907_vm3, %v930_v43 }
 0x381   : > { %3320 = vmatpush3.bf16.msra.mxu1 %v983_v44  ;;  %3321 = vmatprep.mubr.msk.bf16.mxu1 %vm3935_vm0, %v3934_v5 }
 0x382   : > { %3331 = vmatprep.subr.bf16.mxu1 %v3934_v5 }
 0x3a2   : > { %v925_v46 = vpop.xlane.xlu1 %924 }
 0x3a3   : > { %3668 = vrcp.f32 %v925_v46 }
 0x3a6   : > { %v1029_v49 = vpop.permute.xlu1 %1028 }
 0x3a7   : > { %3328 = vmatmul.mubr.msk.bf16.vlgmr.msra.gmra.mxu0 %vm777_vm1, %v1029_v49 }
 0x3a8   : > { %3339 = vmatprep.mubr.msk.bf16.mxu0 %vm3935_vm0, %v3934_v5 }
 0x3aa   : > { %v1081_v55 = vpop.permute.xlu1 %1080 }
 0x3b0   : > { %v3669_v50 = vpop.eup %3668 }
 0x3b1   : > { %v929_v52 = vmul.f32 %v3669_v50, %v3665_v35 }
 0x3b3   : > { %v931_v53 = vpack.c.bf16 %v929_v52, %v929_v52 }
 0x3b5   : > { %3322 = vmatmul.mubr.msk.bf16.vlgmr.msra.gmra.mxu1 %vm907_vm3, %v931_v53 }
 0x3b6   : > { %3332 = vmatpush3.bf16.xpose.msra.mxu1 %v1089_v54  ;;  %3333 = vmatprep.mubr.msk.bf16.mxu1 %vm3935_vm0, %v3934_v5 }
 0x3b7   : > { %3343 = vmatprep.subr.bf16.mxu1 %v3934_v5 }
 0x3bd   : > { %3334 = vmatmul.mubr.msk.bf16.vlgmr.msra.gmra.mxu1 %vm777_vm1, %v1081_v55 }
 0x3be   : > { %3345 = vmatprep.mubr.msk.bf16.mxu1 %vm3935_vm0, %v3934_v5 }
 0x440   : > { %v973_v56 = vpop.f32.mrf.mxu1 }
 0x441   : > { %1025 = vst.msk [vmem:[#allocation3] sm:$0xff] %vm777_vm1, %v973_v56 }
 0x442   : > { %v3317_v58 = vpop.f32.mrf.mxu1 }
 0x444   : > { %v976_v59 = vpop.f32.mrf.mxu1 }
 0x446   : > { %v3318_v60 = vpop.f32.mrf.mxu1 }
 0x467   : > { %v1073_v61 = vpop.f32.mrf.mxu0 }
 0x468   : > { %v1131_v62 = vmul.f32 0.17677669, %v1073_v61 }
 0x469   : > { %v3329_v63 = vpop.f32.mrf.mxu0 }
 0x46a   : > { %v1133_v0 = vadd.f32 %v1131_v62, %v4308_v7 }
 0x46b   : > { %v1076_v1 = vpop.f32.mrf.mxu0 }
 0x46c   : > { %v1135_v2 = vsel %vm907_vm3, %v1133_v0, -inf }
 0x46d   : > { %1136 = vmax.xlane.f32.xlu0 %v1135_v2  ;;  %v3330_v3 = vpop.f32.mrf.mxu0 }
 0x475   : > { %v1019_v6 = vpop.f32.mrf.mxu1 }
 0x476   : > { %1026 = vst.msk [vmem:[#allocation3 + $0x8] sm:$0xff] %vm777_vm1, %v1019_v6 }
 0x477   : > { %v3323_v8 = vpop.f32.mrf.mxu1 }
 0x479   : > { %v1022_v9 = vpop.f32.mrf.mxu1 }
 0x47b   : > { %v3324_v10 = vpop.f32.mrf.mxu1 }
 0x47d   : > { %v1125_v11 = vpop.f32.mrf.mxu1 }
 0x47e   : > { %v1132_v12 = vmul.f32 0.17677669, %v1125_v11 }
 0x47f   : > { %v3335_v13 = vpop.f32.mrf.mxu1 }
 0x480   : > { %v1134_v14 = vadd.f32 %v1132_v12, %v4312_v16 }
 0x481   : > { %v1128_v15 = vpop.f32.mrf.mxu1 }
 0x482   : > { %v1138_v17 = vsel %vm907_vm3, %v1134_v14, -inf }
 0x483   : > { %1139 = vmax.xlane.f32.xlu1 %v1138_v17  ;;  %v3336_v18 = vpop.f32.mrf.mxu1 }
 0x494   : > { %1209 = vrot.lane.b32.xlu1 %v4328_v40, %s3937_s7 }
 0x498   : > { %1270 = vrot.lane.b32.xlu1 %v4276_v42, %s3938_s9 }
 0x49c   : > { %1320 = vrot.lane.b32.xlu1 %v4281_v47, %s3938_s9 }
 0x4a0   : > { %1318 = vrot.lane.b32.xlu1 %v4292_v51, %s3938_s9 }
 0x4f6   : > { %v1137_v19 = vpop.xlane.xlu0 %1136 }
 0x4f7   : > { %v1141_v20 = vsub.f32 %v1133_v0, %v1137_v19 }
 0x4f9   : > { %v1143_v21 = vmul.f32 1.442695, %v1141_v20 }
 0x4fb   : > { %3670 = vpow2.f32 %v1143_v21 }
 0x508   : > { %v3671_v22 = vpop.eup %3670 }
 0x509   : > { %v1147_v23 = vsel %vm907_vm3, %v3671_v22, 0.0 }
 0x50a   : > { %1148 = vadd.xlane.f32.xlu0 %v1147_v23 }
 0x50c   : > { %v1140_v24 = vpop.xlane.xlu1 %1139 }
 0x50d   : > { %v1142_v25 = vsub.f32 %v1134_v14, %v1140_v24 }
 0x50f   : > { %v1145_v26 = vmul.f32 1.442695, %v1142_v25 }
 0x510   : > { %v1210_v27 = vpop.permute.xlu1 %1209 }
 0x511   : > { %3672 = vpow2.f32 %v1145_v26  ;;  %v1215_v28 = vsel %vm935_vm2, %v1210_v27, 0 }
 0x512   : > { %3344 = vmatpush3.bf16.msra.mxu1 %v1215_v28 }
 0x513   : > { %3355 = vmatprep.subr.bf16.mxu1 %v3934_v5 }
 0x514   : > { %v1271_v39 = vpop.permute.xlu1 %1270 }
 0x515   : > { %v1276_v43 = vsel %vm777_vm1, %v1271_v39, 0 }
 0x518   : > { %v1321_v46 = vpop.permute.xlu1 %1320 }
 0x519   : > { %v1326_v52 = vsel %vm777_vm1, %v1321_v46, 0 }
 0x51c   : > { %v1319_v53 = vpop.permute.xlu1 %1318 }
 0x51e   : > { %v3673_v29 = vpop.eup %3672 }
 0x51f   : > { %v1150_v30 = vsel %vm907_vm3, %v3673_v29, 0.0 }
 0x520   : > { %1151 = vadd.xlane.f32.xlu0 %v1150_v30 }
 0x536   : > { %1160 = vrot.lane.b32.xlu0 %v4299_v57, %s3937_s7 }
 0x53a   : > { %1268 = vrot.lane.b32.xlu0 %v4283_v48, %s3938_s9 }
 0x593   : > { %v1149_v31 = vpop.xlane.xlu0 %1148 }
 0x594   : > { %3674 = vrcp.f32 %v1149_v31 }
 0x5a1   : > { %v3675_v33 = vpop.eup %3674 }
 0x5a2   : > { %v1155_v35 = vmul.f32 %v3675_v33, %v3671_v22 }
 0x5a4   : > { %v1157_v41 = vpack.c.bf16 %v1155_v35, %v1155_v35 }
 0x5a9   : > { %v1152_v34 = vpop.xlane.xlu0 %1151 }
 0x5aa   : > { %3676 = vrcp.f32 %v1152_v34 }
 0x5ad   : > { %v1161_v36 = vpop.permute.xlu0 %1160 }
 0x5ae   : > { %v1166_v38 = vsel %vm935_vm2, %v1161_v36, 0 }
 0x5af   : > { %3338 = vmatpush3.bf16.msra.mxu0 %v1166_v38 }
 0x5b0   : > { %3349 = vmatprep.subr.bf16.mxu0 %v3934_v5 }
 0x5b1   : > { %v1269_v49 = vpop.permute.xlu0 %1268 }
 0x5b2   : > { %3340 = vmatmul.mubr.msk.bf16.vlgmr.msra.gmra.mxu0 %vm907_vm3, %v1157_v41 }
 0x5b3   : > { %3350 = vmatpush3.bf16.xpose.msra.mxu0 %v1276_v43  ;;  %3351 = vmatprep.mubr.msk.bf16.mxu0 %vm3935_vm0, %v3934_v5 }
 0x5b4   : > { %3361 = vmatprep.subr.bf16.mxu0 %v3934_v5 }
 0x5b7   : > { %v3677_v44 = vpop.eup %3676 }
 0x5b8   : > { %v1156_v45 = vmul.f32 %v3677_v44, %v3673_v29 }
 0x5ba   : > { %3352 = vmatmul.mubr.msk.bf16.vlgmr.msra.gmra.mxu0 %vm777_vm1, %v1269_v49  ;;  %v1158_v50 = vpack.c.bf16 %v1156_v45, %v1156_v45 }
 0x5bb   : > { %3363 = vmatprep.mubr.msk.bf16.mxu0 %vm3935_vm0, %v3934_v5 }
 0x5bc   : > { %3346 = vmatmul.mubr.msk.bf16.vlgmr.msra.gmra.mxu1 %vm907_vm3, %v1158_v50 }
 0x5bd   : > { %3356 = vmatpush3.bf16.xpose.msra.mxu1 %v1326_v52  ;;  %3357 = vmatprep.mubr.msk.bf16.mxu1 %vm3935_vm0, %v3934_v5 }
 0x5be   : > { %3367 = vmatprep.subr.bf16.mxu1 %v3934_v5 }
 0x5c4   : > { %3358 = vmatmul.mubr.msk.bf16.vlgmr.msra.gmra.mxu1 %vm777_vm1, %v1319_v53 }
 0x5c5   : > { %3369 = vmatprep.mubr.msk.bf16.mxu1 %vm3935_vm0, %v3934_v5 }
 0x672   : > { %v4387_v54 = vpop.f32.mrf.mxu0 }
 0x674   : > { %v3341_v55 = vpop.f32.mrf.mxu0 }
 0x676   : > { %v1205_v56 = vpop.f32.mrf.mxu0 }
 0x678   : > { %v3342_v58 = vpop.f32.mrf.mxu0 }
 0x67a   : > { %v1312_v59 = vpop.f32.mrf.mxu0 }
 0x67b   : > { %v1368_v60 = vmul.f32 0.17677669, %v1312_v59 }
 0x67c   : > { %v4389_v61 = vpop.f32.mrf.mxu1  ;;  %v3353_v62 = vpop.f32.mrf.mxu0 }
 0x67d   : > { %v1370_v63 = vadd.f32 %v1368_v60, %v4308_v7 }
 0x67e   : > { %v3347_v0 = vpop.f32.mrf.mxu1  ;;  %v1315_v1 = vpop.f32.mrf.mxu0 }
 0x67f   : > { %v1372_v2 = vsel %vm907_vm3, %v1370_v63, -inf }
 0x680   : > { %1373 = vmax.xlane.f32.xlu0 %v1372_v2  ;;  %v1254_v3 = vpop.f32.mrf.mxu1  ;;  %v3354_v6 = vpop.f32.mrf.mxu0 }
 0x682   : > { %v3348_v8 = vpop.f32.mrf.mxu1 }
 0x684   : > { %v1362_v9 = vpop.f32.mrf.mxu1 }
 0x685   : > { %v1369_v10 = vmul.f32 0.17677669, %v1362_v9 }
 0x686   : > { %v3359_v11 = vpop.f32.mrf.mxu1 }
 0x687   : > { %v1371_v12 = vadd.f32 %v1369_v10, %v4312_v16 }
 0x688   : > { %v1365_v13 = vpop.f32.mrf.mxu1 }
 0x689   : > { %v1375_v14 = vsel %vm907_vm3, %v1371_v12, -inf }
 0x68a   : > { %1376 = vmax.xlane.f32.xlu1 %v1375_v14  ;;  %v3360_v15 = vpop.f32.mrf.mxu1 }
 0x69b   : > { %1444 = vrot.lane.b32.xlu1 %v4328_v40, %s3938_s9 }
 0x69f   : > { %1505 = vrot.lane.b32.xlu1 %v4276_v42, %s3939_s24 }
 0x6a3   : > { %1555 = vrot.lane.b32.xlu1 %v4281_v47, %s3939_s24 }
 0x6a7   : > { %1553 = vrot.lane.b32.xlu1 %v4292_v51, %s3939_s24 }
 0x709   : > { %v1374_v17 = vpop.xlane.xlu0 %1373 }
 0x70a   : > { %v1378_v18 = vsub.f32 %v1370_v63, %v1374_v17 }
 0x70c   : > { %v1380_v19 = vmul.f32 1.442695, %v1378_v18 }
 0x70e   : > { %3678 = vpow2.f32 %v1380_v19 }
 0x713   : > { %v1377_v20 = vpop.xlane.xlu1 %1376 }
 0x714   : > { %v1379_v21 = vsub.f32 %v1371_v12, %v1377_v20 }
 0x716   : > { %v1382_v22 = vmul.f32 1.442695, %v1379_v21 }
 0x717   : > { %v1445_v23 = vpop.permute.xlu1 %1444 }
 0x718   : > { %3680 = vpow2.f32 %v1382_v22  ;;  %v1450_v24 = vsel %vm935_vm2, %v1445_v23, 0 }
 0x719   : > { %3368 = vmatpush3.bf16.msra.mxu1 %v1450_v24 }
 0x71a   : > { %3379 = vmatprep.subr.bf16.mxu1 %v3934_v5 }
 0x71b   : > { %v3679_v42 = vpop.eup %3678  ;;  %v1506_v33 = vpop.permute.xlu1 %1505 }
 0x71c   : > { %v1384_v47 = vsel %vm907_vm3, %v3679_v42, 0.0  ;;  %v1511_v35 = vsel %vm777_vm1, %v1506_v33, 0  ;;  %v3576_v33 = vld [vmem:[%s4212_s27 + $0x28] sm:$0xff]  }
 0x71d   : > { %1385 = vadd.xlane.f32.xlu0 %v1384_v47 }
 0x71f   : > { %v1556_v38 = vpop.permute.xlu1 %1555 }
 0x720   : > { %v1561_v43 = vsel %vm777_vm1, %v1556_v38, 0 }
 0x723   : > { %v1554_v44 = vpop.permute.xlu1 %1553 }
 0x725   : > { %v3681_v25 = vpop.eup %3680 }
 0x726   : > { %v1387_v51 = vsel %vm907_vm3, %v3681_v25, 0.0 }
 0x727   : > { %1388 = vadd.xlane.f32.xlu0 %v1387_v51 }
 0x73d   : > { %1396 = vrot.lane.b32.xlu0 %v4299_v57, %s3938_s9 }
 0x741   : > { %1503 = vrot.lane.b32.xlu0 %v4283_v48, %s3939_s24 }
 0x7a6   : > { %v1386_v26 = vpop.xlane.xlu0 %1385 }
 0x7a7   : > { %3682 = vrcp.f32 %v1386_v26 }
 0x7b0   : > { %v1389_v27 = vpop.xlane.xlu0 %1388 }
 0x7b1   : > { %3684 = vrcp.f32 %v1389_v27 }
 0x7b4   : > { %v3683_v28 = vpop.eup %3682  ;;  %v1397_v29 = vpop.permute.xlu0 %1396 }
 0x7b5   : > { %v1402_v30 = vsel %vm935_vm2, %v1397_v29, 0  ;;  %v1392_v31 = vmul.f32 %v3683_v28, %v3679_v42 }
 0x7b6   : > { %3362 = vmatpush3.bf16.msra.mxu0 %v1402_v30  ;;  %v3574_v30 = vld [vmem:[%s4212_s27 + $0x38] sm:$0xff]  }
 0x7b7   : > { %v1394_v34 = vpack.c.bf16 %v1392_v31, %v1392_v31  ;;  %3373 = vmatprep.subr.bf16.mxu0 %v3934_v5  ;;  %v3575_v31 = vld [vmem:[%s4212_s27 + $0x30] sm:$0xff]  }
 0x7b8   : > { %v1504_v39 = vpop.permute.xlu0 %1503 }
 0x7b9   : > { %3364 = vmatmul.mubr.msk.bf16.vlgmr.msra.gmra.mxu0 %vm907_vm3, %v1394_v34  ;;  %v3577_v34 = vld [vmem:[%s4212_s27 + $0x20] sm:$0xff]  }
 0x7ba   : > { %3374 = vmatpush3.bf16.xpose.msra.mxu0 %v1511_v35  ;;  %3375 = vmatprep.mubr.msk.bf16.mxu0 %vm3935_vm0, %v3934_v5  ;;  %v3578_v35 = vld [vmem:[%s4212_s27 + $0x18] sm:$0xff]  }
 0x7bb   : > { %3385 = vmatprep.subr.bf16.mxu0 %v3934_v5 }
 0x7be   : > { %v3685_v48 = vpop.eup %3684 }
 0x7bf   : > { %v1393_v36 = vmul.f32 %v3685_v48, %v3681_v25  ;;  %v3579_v48 = vld [vmem:[%s4212_s27 + $0x10] sm:$0xff]  }
 0x7c1   : > { %3376 = vmatmul.mubr.msk.bf16.vlgmr.msra.gmra.mxu0 %vm777_vm1, %v1504_v39  ;;  %v1395_v41 = vpack.c.bf16 %v1393_v36, %v1393_v36  ;;  %v3580_v36 = vld [vmem:[%s4212_s27 + $0x8] sm:$0xff]  }
 0x7c2   : > { %3387 = vmatprep.mubr.msk.bf16.mxu0 %vm3935_vm0, %v3934_v5 }
 0x7c3   : > { %3370 = vmatmul.mubr.msk.bf16.vlgmr.msra.gmra.mxu1 %vm907_vm3, %v1395_v41  ;;  %v3581_v41 = vld [vmem:[%s4212_s27] sm:$0xff]  }
 0x7c4   : > { %3380 = vmatpush3.bf16.xpose.msra.mxu1 %v1561_v43  ;;  %3381 = vmatprep.mubr.msk.bf16.mxu1 %vm3935_vm0, %v3934_v5 }
 0x7c5   : > { %3391 = vmatprep.subr.bf16.mxu1 %v3934_v5 }
 0x7cb   : > { %3382 = vmatmul.mubr.msk.bf16.vlgmr.msra.gmra.mxu1 %vm777_vm1, %v1554_v44 }
 0x7cc   : > { %3393 = vmatprep.mubr.msk.bf16.mxu1 %vm3935_vm0, %v3934_v5 }
 0x879   : > { %v1438_v45 = vpop.f32.mrf.mxu0 }
 0x87b   : > { %v3365_v46 = vpop.f32.mrf.mxu0 }
 0x87d   : > { %v1441_v49 = vpop.f32.mrf.mxu0 }
 0x87f   : > { %v3366_v50 = vpop.f32.mrf.mxu0 }
 0x881   : > { %v1547_v52 = vpop.f32.mrf.mxu0 }
 0x882   : > { %v1603_v53 = vmul.f32 0.17677669, %v1547_v52 }
 0x883   : > { %v1486_v55 = vpop.f32.mrf.mxu1  ;;  %v3377_v56 = vpop.f32.mrf.mxu0 }
 0x884   : > { %v1605_v58 = vadd.f32 %v1603_v53, %v4308_v7 }
 0x885   : > { %v3371_v59 = vpop.f32.mrf.mxu1  ;;  %v1550_v60 = vpop.f32.mrf.mxu0 }
 0x886   : > { %v1607_v62 = vsel %vm907_vm3, %v1605_v58, -inf }
 0x887   : > { %1608 = vmax.xlane.f32.xlu0 %v1607_v62  ;;  %v1489_v63 = vpop.f32.mrf.mxu1  ;;  %v3378_v0 = vpop.f32.mrf.mxu0 }
 0x888   : > { %v3718_v0 = vld [vmem:[#allocation2] sm:$0xff] }
 0x889   : > { %v3372_v1 = vpop.f32.mrf.mxu1 }
 0x88b   : > { %v1597_v2 = vpop.f32.mrf.mxu1 }
 0x88c   : > { %v1604_v3 = vmul.f32 0.17677669, %v1597_v2 }
 0x88d   : > { %v3383_v6 = vpop.f32.mrf.mxu1 }
 0x88e   : > { %v1606_v8 = vadd.f32 %v1604_v3, %v4312_v16 }
 0x88f   : > { %v1600_v9 = vpop.f32.mrf.mxu1 }
 0x890   : > { %v1610_v10 = vsel %vm907_vm3, %v1606_v8, -inf }
 0x891   : > { %1611 = vmax.xlane.f32.xlu1 %v1610_v10  ;;  %v3384_v11 = vpop.f32.mrf.mxu1  ;;  %v3584_v10 = vld [vmem:[%s4195_s11 + $0xe4] ss:$16 sps:$4 sm:$0xff]  }
 0x892   : > { %v3585_v11 = vld [vmem:[%s4195_s11 + $0xe8] ss:$16 sps:$4 sm:$0xff]  }
 0x8a2   : > { %1679 = vrot.lane.b32.xlu1 %v4328_v40, %s3939_s24 }
 0x8a6   : > { %1259 = vrot.lane.b32.xlu1 %v4387_v54, %s3939_s24 }
 0x8aa   : > { %1261 = vrot.lane.b32.xlu1 %v4389_v61, %s3939_s24 }
 0x8ae   : > { %1496 = vrot.lane.b32.xlu1 %v1486_v55, %s3938_s9 }
 0x910   : > { %v1609_v7 = vpop.xlane.xlu0 %1608 }
 0x911   : > { %v1613_v12 = vsub.f32 %v1605_v58, %v1609_v7  ;;  %v3587_v7 = vld [vmem:[%s4195_s11 + $0xec] ss:$16 sps:$4 sm:$0xff]  }
 0x913   : > { %v1615_v13 = vmul.f32 1.442695, %v1613_v12 }
 0x915   : > { %3686 = vpow2.f32 %v1615_v13 }
 0x91a   : > { %v1612_v16 = vpop.xlane.xlu1 %1611 }
 0x91b   : > { %v1614_v14 = vsub.f32 %v1606_v8, %v1612_v16  ;;  %v3719_v8 = vld [vmem:[#allocation2 + $0x8] sm:$0xff] }
 0x91d   : > { %v1617_v15 = vmul.f32 1.442695, %v1614_v14 }
 0x91e   : > { %v1680_v17 = vpop.permute.xlu1 %1679 }
 0x91f   : > { %3688 = vpow2.f32 %v1617_v15  ;;  %v1685_v18 = vsel %vm935_vm2, %v1680_v17, 0 }
 0x920   : > { %3392 = vmatpush3.bf16.msra.mxu1 %v1685_v18 }
 0x921   : > { %2096 = vmatprep.subr.bf16.mxu1 %v3584_v10  ;;  %v3635_v10 = vld [vmem:[%s4201_s22 + $0xf0] sm:$0xff]  }
 0x922   : > { %v3687_v40 = vpop.eup %3686  ;;  %v1260_v54 = vpop.permute.xlu1 %1259 }
 0x923   : > { %1266 = vst.msk [vmem:[#allocation3] sm:$0xff] %vm1265_vm4, %v1260_v54  ;;  %v1619_v61 = vsel %vm907_vm3, %v3687_v40, 0.0  ;;  %v3590_v54 = vld [vmem:[%s4195_s11 + $0xc4] ss:$16 sps:$4 sm:$0xff]  }
 0x924   : > { %1620 = vadd.xlane.f32.xlu0 %v1619_v61  ;;  %v3593_v61 = vld [vmem:[%s4195_s11 + $0xcc] ss:$16 sps:$4 sm:$0xff]  }
 0x926   : > { %v1262_v19 = vpop.permute.xlu1 %1261 }
 0x927   : > { %1267 = vst.msk [vmem:[#allocation3 + $0x8] sm:$0xff] %vm1265_vm4, %v1262_v19  ;;  %v3588_v19 = vld [vmem:[%s4195_s11 + $0xc0] ss:$16 sps:$4 sm:$0xff]  }
 0x92a   : > { %v1497_v20 = vpop.permute.xlu1 %1496 }
 0x92b   : > { %1502 = vst.msk [vmem:[#allocation3 + $0x8] sm:$0xff] %vm1500_vm5, %v1497_v20  ;;  %v3591_v20 = vld [vmem:[%s4195_s11 + $0xc8] ss:$16 sps:$4 sm:$0xff]  }
 0x92c   : > { %v3689_v21 = vpop.eup %3688 }
 0x92d   : > { %v1622_v22 = vsel %vm907_vm3, %v3689_v21, 0.0 }
 0x92e   : > { %1623 = vadd.xlane.f32.xlu0 %v1622_v22  ;;  %v3599_v22 = vld [vmem:[%s4195_s11 + $0xac] ss:$16 sps:$4 sm:$0xff]  }
 0x944   : > { %1631 = vrot.lane.b32.xlu0 %v4299_v57, %s3939_s24 }
 0x948   : > { %1494 = vrot.lane.b32.xlu0 %v1438_v45, %s3938_s9 }
 0x9ad   : > { %v1621_v23 = vpop.xlane.xlu0 %1620 }
 0x9ae   : > { %3690 = vrcp.f32 %v1621_v23  ;;  %v3594_v23 = vld [vmem:[%s4195_s11 + $0xa0] ss:$16 sps:$4 sm:$0xff]  }
 0x9b7   : > { %v1624_v24 = vpop.xlane.xlu0 %1623 }
 0x9b8   : > { %3692 = vrcp.f32 %v1624_v24  ;;  %v3597_v24 = vld [vmem:[%s4195_s11 + $0xa8] ss:$16 sps:$4 sm:$0xff]  }
 0x9bb   : > { %v3691_v42 = vpop.eup %3690  ;;  %v1632_v47 = vpop.permute.xlu0 %1631 }
 0x9bc   : > { %v1637_v25 = vsel %vm935_vm2, %v1632_v47, 0  ;;  %v1627_v51 = vmul.f32 %v3691_v42, %v3687_v40  ;;  %v3600_v42 = vld [vmem:[%s4195_s11 + $0x80] ss:$16 sps:$4 sm:$0xff]   ;;  %v3602_v47 = vld [vmem:[%s4195_s11 + $0x84] ss:$16 sps:$4 sm:$0xff]  }
 0x9bd   : > { %3386 = vmatpush3.bf16.msra.mxu0 %v1637_v25  ;;  %v3603_v25 = vld [vmem:[%s4195_s11 + $0x88] ss:$16 sps:$4 sm:$0xff]  }
 0x9be   : > { %v1629_v26 = vpack.c.bf16 %v1627_v51, %v1627_v51  ;;  %3397 = vmatprep.subr.bf16.mxu0 %v3934_v5  ;;  %v3605_v51 = vld [vmem:[%s4195_s11 + $0x8c] ss:$16 sps:$4 sm:$0xff]  }
 0x9bf   : > { %v1495_v27 = vpop.permute.xlu0 %1494 }
 0x9c0   : > { %1501 = vst.msk [vmem:[#allocation3] sm:$0xff] %vm1500_vm5, %v1495_v27  ;;  %3388 = vmatmul.mubr.msk.bf16.vlgmr.msra.gmra.mxu0 %vm907_vm3, %v1629_v26  ;;  %v3608_v26 = vld [vmem:[%s4195_s11 + $0x64] ss:$16 sps:$4 sm:$0xff]   ;;  %v3611_v27 = vld [vmem:[%s4195_s11 + $0x6c] ss:$16 sps:$4 sm:$0xff]  }
 0x9c1   : > { %3413 = vmatprep.mubr.msk.bf16.mxu0 %vm3935_vm0, %v3934_v5  ;;  %3398 = vmatpush3.bf16.msra.mxu0 %v3574_v30  ;;  %v3617_v30 = vld [vmem:[%s4195_s11 + $0x4c] ss:$16 sps:$4 sm:$0xff]  }
 0x9c2   : > { %3399 = vmatprep.subr.bf16.mxu0 %v3934_v5 }
 0x9c5   : > { %v3693_v57 = vpop.eup %3692  ;;  %3400 = vmatpush3.bf16.msra.mxu0 %v3575_v31  ;;  %v3612_v31 = vld [vmem:[%s4195_s11 + $0x40] ss:$16 sps:$4 sm:$0xff]  }
 0x9c6   : > { %v1628_v28 = vmul.f32 %v3693_v57, %v3689_v21  ;;  %3401 = vmatprep.subr.bf16.mxu0 %v3934_v5  ;;  %v3596_v21 = vld [vmem:[%s4195_s11 + $0xa4] ss:$16 sps:$4 sm:$0xff]   ;;  %v3606_v57 = vld [vmem:[%s4195_s11 + $0x60] ss:$16 sps:$4 sm:$0xff]  }
 0x9c8   : > { %v1630_v29 = vpack.c.bf16 %v1628_v28, %v1628_v28  ;;  %v3609_v28 = vld [vmem:[%s4195_s11 + $0x68] ss:$16 sps:$4 sm:$0xff]  }
 0x9c9   : > { %3402 = vmatpush3.bf16.msra.mxu0 %v3576_v33  ;;  %v3615_v33 = vld [vmem:[%s4195_s11 + $0x48] ss:$16 sps:$4 sm:$0xff]  }
 0x9ca   : > { %3394 = vmatmul.mubr.msk.bf16.vlgmr.msra.gmra.mxu1 %vm907_vm3, %v1630_v29  ;;  %3403 = vmatprep.subr.bf16.mxu0 %v3934_v5  ;;  %v3614_v29 = vld [vmem:[%s4195_s11 + $0x44] ss:$16 sps:$4 sm:$0xff]  }
 0x9cb   : > { %2128 = vmatprep.mubr.bf16.mxu1 %v3933_v4 }
 0x9cd   : > { %3404 = vmatpush3.bf16.msra.mxu0 %v3577_v34  ;;  %v3620_v34 = vld [vmem:[%s4195_s11 + $0x24] ss:$16 sps:$4 sm:$0xff]  }
 0x9ce   : > { %3405 = vmatprep.subr.bf16.mxu0 %v3934_v5 }
 0x9d1   : > { %3406 = vmatpush3.bf16.msra.mxu0 %v3578_v35  ;;  %v3623_v35 = vld [vmem:[%s4195_s11 + $0x2c] ss:$16 sps:$4 sm:$0xff]  }
 0x9d2   : > { %3407 = vmatprep.subr.bf16.mxu0 %v3934_v5 }
 0x9d5   : > { %3408 = vmatpush3.bf16.msra.mxu0 %v3579_v48  ;;  %v3618_v48 = vld [vmem:[%s4195_s11 + $0x20] ss:$16 sps:$4 sm:$0xff]  }
 0x9d6   : > { %3409 = vmatprep.subr.bf16.mxu0 %v3934_v5 }
 0x9d9   : > { %3410 = vmatpush3.bf16.msra.mxu0 %v3580_v36  ;;  %v3621_v36 = vld [vmem:[%s4195_s11 + $0x28] ss:$16 sps:$4 sm:$0xff]  }
 0x9da   : > { %3411 = vmatprep.subr.bf16.mxu0 %v3934_v5  ;;  %v1759_v5 = vsub.s32 2, %v4268_v32 }
 0x9dc   : > { %v1760_v59 = vrot.slane %v4273_v37, %v1759_v5  ;;  %v1883_v5 = vsub.s32 4, %v4268_v32 }
 0x9dd   : > { %3412 = vmatpush3.bf16.msra.mxu0 %v3581_v41  ;;  %v3624_v41 = vld [vmem:[%s4195_s11] ss:$16 sps:$4 sm:$0xff]  }
 0x9de   : > { %2139 = vmatprep.subr.bf16.mxu0 %v3587_v7  ;;  %v3637_v7 = vld [vmem:[%s4201_s22 + $0xb0] sm:$0xff]  }
 0xa80   : > { %v1673_v38 = vpop.f32.mrf.mxu0 }
 0xa81   : > { %1729 = vrot.lane.b32.xlu0 %v1673_v38, %s3937_s7  ;;  %v3626_v38 = vld [vmem:[%s4195_s11 + $0x4] ss:$16 sps:$4 sm:$0xff]  }
 0xa82   : > { %v3389_v39 = vpop.f32.mrf.mxu0 }
 0xa83   : > { %v3629_v39 = vld [vmem:[%s4195_s11 + $0xc] ss:$16 sps:$4 sm:$0xff]  }
 0xa84   : > { %v1676_v43 = vpop.f32.mrf.mxu0 }
 0xa85   : > { %v3627_v43 = vld [vmem:[%s4195_s11 + $0x8] ss:$16 sps:$4 sm:$0xff]  }
 0xa86   : > { %v3390_v44 = vpop.f32.mrf.mxu0 }
 0xa8a   : > { %v1721_v45 = vpop.f32.mrf.mxu1 }
 0xa8b   : > { %1731 = vrot.lane.b32.xlu1 %v1721_v45, %s3937_s7  ;;  %s4707_s7 = smov (!%p3142_p3), %s4706_s13 }
 0xa8c   : > { %v3395_v46 = vpop.f32.mrf.mxu1 }
 0xa8e   : > { %v1724_v49 = vpop.f32.mrf.mxu1 }
 0xa90   : > { %v3396_v50 = vpop.f32.mrf.mxu1 }
 0xaf3   : > { %v1730_v52 = vpop.permute.xlu0 %1729 }
 0xaf4   : > { %1736 = vst.msk [vmem:[#allocation3] sm:$0xff] %vm1735_vm6, %v1730_v52 }
 0xafb   : > { %v1738_v55 = vld [vmem:[#allocation3] sm:$0xff] }
 0xafd   : > { %v1732_v53 = vpop.permute.xlu1 %1731 }
 0xafe   : > { %1737 = vst.msk [vmem:[#allocation3 + $0x8] sm:$0xff] %vm1735_vm6, %v1732_v53  ;;  %v1877_v53 = vsub.s32 3, %v4268_v32 }
 0xb05   : > { %v1739_v56 = vld [vmem:[#allocation3 + $0x8] sm:$0xff] }
 0xb06   : > { %v1756_v58 = vpack.c.bf16 %v1739_v56, %v1738_v55 }
 0xb08   : > { %3414 = vmatmul.mubr.bf16.vlgmr.msra.gmra.mxu0 %v1756_v58  ;;  %v1878_v58 = vrot.slane %v4273_v37, %v1877_v53 }
 0xb09   : > { %2171 = vmatprep.mubr.bf16.mxu0 %v3933_v4  ;;  %v3582_v4 = vld [vmem:[%s4195_s11 + $0xe0] ss:$16 sps:$4 sm:$0xff]   ;;  %2140 = vmatpush1.bf16.msra.mxu0 %v3585_v11  ;;  %s4705_s11 = sld [smem:[#allocation23_spill]] (!%p3142_p3) }
 0xb0a   : > { %2097 = vmatpush1.bf16.msra.mxu1 %v3582_v4  ;;  %2141 = vmatprep.subr.bf16.mxu0 %v3593_v61  ;;  %v3634_v4 = vld [vmem:[%s4201_s22 + $0x70] sm:$0xff]   ;;  %v3647_v61 = vld [vmem:[%s4201_s22 + $0xd8] sm:$0xff]  }
 0xb0b   : > { %2098 = vmatprep.subr.bf16.mxu1 %v3590_v54  ;;  %v3636_v11 = vld [vmem:[%s4201_s22 + $0x30] sm:$0xff]   ;;  %v3646_v54 = vld [vmem:[%s4201_s22 + $0x58] sm:$0xff]  }
 0xb0d   : > { %2142 = vmatpush1.bf16.msra.mxu0 %v3591_v20  ;;  %v3649_v20 = vld [vmem:[%s4201_s22 + $0x98] sm:$0xff]  }
 0xb0e   : > { %2099 = vmatpush1.bf16.msra.mxu1 %v3588_v19  ;;  %2143 = vmatprep.subr.bf16.mxu0 %v3599_v22  ;;  %v3648_v19 = vld [vmem:[%s4201_s22 + $0x18] sm:$0xff]   ;;  %v3651_v22 = vld [vmem:[%s4201_s22 + $0xd0] sm:$0xff]  }
 0xb0f   : > { %2100 = vmatprep.subr.bf16.mxu1 %v3596_v21  ;;  %v3650_v21 = vld [vmem:[%s4201_s22 + $0x50] sm:$0xff]  }
 0xb11   : > { %2144 = vmatpush1.bf16.msra.mxu0 %v3597_v24  ;;  %v3653_v24 = vld [vmem:[%s4201_s22 + $0x90] sm:$0xff]  }
 0xb12   : > { %2101 = vmatpush1.bf16.msra.mxu1 %v3594_v23  ;;  %2145 = vmatprep.subr.bf16.mxu0 %v3605_v51  ;;  %v3652_v23 = vld [vmem:[%s4201_s22 + $0x10] sm:$0xff]   ;;  %v3657_v51 = vld [vmem:[%s4201_s22 + $0x88] sm:$0xff]  }
 0xb13   : > { %2102 = vmatprep.subr.bf16.mxu1 %v3602_v47  ;;  %v3655_v47 = vld [vmem:[%s4201_s22 + $0xc8] sm:$0xff]  }
 0xb15   : > { %2146 = vmatpush1.bf16.msra.mxu0 %v3603_v25  ;;  %v3656_v25 = vld [vmem:[%s4201_s22 + $0x8] sm:$0xff]  }
 0xb16   : > { %2103 = vmatpush1.bf16.msra.mxu1 %v3600_v42  ;;  %2147 = vmatprep.subr.bf16.mxu0 %v3611_v27  ;;  %v3654_v42 = vld [vmem:[%s4201_s22 + $0x48] sm:$0xff]   ;;  %v3659_v27 = vld [vmem:[%s4201_s22 + $0xc0] sm:$0xff]  }
 0xb17   : > { %2104 = vmatprep.subr.bf16.mxu1 %v3608_v26  ;;  %v3658_v26 = vld [vmem:[%s4201_s22 + $0x40] sm:$0xff]  }
 0xb19   : > { %2148 = vmatpush1.bf16.msra.mxu0 %v3609_v28  ;;  %v3661_v28 = vld [vmem:[%s4201_s22 + $0x80] sm:$0xff]  }
 0xb1a   : > { %2105 = vmatpush1.bf16.msra.mxu1 %v3606_v57  ;;  %2149 = vmatprep.subr.bf16.mxu0 %v3617_v30  ;;  %v3660_v57 = vld [vmem:[%s4201_s22] sm:$0xff]   ;;  %v513_v30 = vld [vmem:[%s4217_s15 + $0x18] sm:$0xff] }
 0xb1b   : > { %2106 = vmatprep.subr.bf16.mxu1 %v3614_v29  ;;  %v1922_v29 = vsub.s32 1, %v4268_v32 }
 0xb1d   : > { %2150 = vmatpush1.bf16.msra.mxu0 %v3615_v33 }
 0xb1e   : > { %2107 = vmatpush1.bf16.msra.mxu1 %v3612_v31  ;;  %2151 = vmatprep.subr.bf16.mxu0 %v3623_v35  ;;  %v4562_v31 = vld [vmem:[%s4217_s15] sm:$0xff] }
 0xb1f   : > { %2108 = vmatprep.subr.bf16.mxu1 %v3620_v34  ;;  %v1923_v33 = vrot.slane %v4562_v31, %v1922_v29  ;;  %v3721_v34 = vld [vmem:[%s4217_s15 + $0x10] sm:$0xff] }
 0xb20   : > { %v1931_v35 = vrot.slane %v3721_v34, %v1922_v29 }
 0xb21   : > { %2152 = vmatpush1.bf16.msra.mxu0 %v3621_v36 }
 0xb22   : > { %2109 = vmatpush1.bf16.msra.mxu1 %v3618_v48  ;;  %2153 = vmatprep.subr.bf16.mxu0 %v3629_v39  ;;  %v3722_v48 = vld [vmem:[%s4217_s15 + $0x8] sm:$0xff] }
 0xb23   : > { %2110 = vmatprep.subr.bf16.mxu1 %v3626_v38  ;;  %v1927_v36 = vrot.slane %v3722_v48, %v1922_v29  ;;  %v1935_v38 = vrot.slane %v513_v30, %v1922_v29 }
 0xb25   : > { %2154 = vmatpush1.bf16.msra.mxu0 %v3627_v43 }
 0xb26   : > { %2111 = vmatpush1.bf16.msra.mxu1 %v3624_v41 }
 0xbc8   : > { %v1843_v60 = vpop.f32.mrf.mxu0 }
 0xbc9   : > { %v1844_v62 = vadd.f32 %v1843_v60, %v1760_v59 }
 0xbca   : > { %v3415_v63 = vpop.f32.mrf.mxu0 }
 0xbcb   : > { %v1850_v1 = vadd.f32 %v3718_v0, %v1844_v62  ;;  %v1884_v63 = vrot.slane %v4273_v37, %v1883_v5  ;;  %v3633_v37 = vld [vmem:[%s4201_s22 + $0xb8] sm:$0xff]  }
 0xbcc   : > { %v1846_v2 = vpop.f32.mrf.mxu0 }
 0xbcd   : > { %v1847_v3 = vadd.f32 %v1846_v2, %v1760_v59  ;;  %1852 = vadd.xlane.f32.xlu0 %v1850_v1 }
 0xbce   : > { %v3416_v6 = vpop.f32.mrf.mxu0 }
 0xbcf   : > { %v1851_v9 = vadd.f32 %v3719_v8, %v1847_v3  ;;  %v3630_v6 = vld [vmem:[%s4201_s22 + $0x78] sm:$0xff]  }
 0xbd0   : > { %v3631_v8 = vld [vmem:[%s4201_s22 + $0xf8] sm:$0xff]   ;;  %3219 = vmatprep.subr.bf16.mxu1 %v3630_v6 }
 0xbd1   : > { %1854 = vadd.xlane.f32.xlu1 %v1851_v9  ;;  %3241 = vmatprep.subr.bf16.mxu0 %v3631_v8 }
 0xc56   : > { %v1853_v12 = vpop.xlane.xlu0 %1852 }
 0xc57   : > { %v1857_v13 = vmul.f32 0.0078125, %v1853_v12  ;;  %v3638_v12 = vld [vmem:[%s4201_s22 + $0x68] sm:$0xff]  }
 0xc59   : > { %v4479_v16 = vsub.f32 %v1850_v1, %v1857_v13  ;;  %v3639_v13 = vld [vmem:[%s4201_s22 + $0xe8] sm:$0xff]  }
 0xc5a   : > { %v1855_v14 = vpop.xlane.xlu1 %1854 }
 0xc5b   : > { %v1858_v15 = vmul.f32 0.0078125, %v1855_v14  ;;  %v1861_v17 = vmul.f32 %v4479_v16, %v4479_v16  ;;  %v3641_v14 = vld [vmem:[%s4201_s22 + $0xa8] sm:$0xff]  }
 0xc5d   : > { %v4483_v18 = vsub.f32 %v1851_v9, %v1858_v15  ;;  %1863 = vadd.xlane.f32.xlu0 %v1861_v17  ;;  %v3632_v9 = vld [vmem:[%s4201_s22 + $0x38] sm:$0xff]   ;;  %v3642_v15 = vld [vmem:[%s4201_s22 + $0x60] sm:$0xff]  }
 0xc5e   : > { %v3643_v17 = vld [vmem:[%s4201_s22 + $0xe0] sm:$0xff]  }
 0xc5f   : > { %v1862_v40 = vmul.f32 %v4483_v18, %v4483_v18 }
 0xc61   : > { %1865 = vadd.xlane.f32.xlu0 %v1862_v40  ;;  %v3645_v40 = vld [vmem:[%s4201_s22 + $0xa0] sm:$0xff]  }
 0xce6   : > { %v1864_v44 = vpop.xlane.xlu0 %1863 }
 0xce7   : > { %v1867_v45 = vmul.f32 0.0078125, %v1864_v44 }
 0xce9   : > { %v1869_v46 = vadd.f32 1e-12, %v1867_v45 }
 0xcea   : > { %v1866_v49 = vpop.xlane.xlu0 %1865 }
 0xceb   : > { %3694 = vrsqrt.f32 %v1869_v46  ;;  %v1868_v50 = vmul.f32 0.0078125, %v1866_v49 }
 0xced   : > { %v1870_v52 = vadd.f32 1e-12, %v1868_v50 }
 0xcef   : > { %3696 = vrsqrt.f32 %v1870_v52 }
 0xcf8   : > { %v3695_v55 = vpop.eup %3694 }
 0xcf9   : > { %v1873_v56 = vmul.f32 %v3695_v55, %v4479_v16  ;;  %v3640_v16 = vld [vmem:[%s4201_s22 + $0x28] sm:$0xff]  }
 0xcfb   : > { %v1879_v62 = vmul.f32 %v1878_v58, %v1873_v56 }
 0xcfc   : > { %v3697_v59 = vpop.eup %3696 }
 0xcfd   : > { %v1874_v60 = vmul.f32 %v3697_v59, %v4483_v18  ;;  %v4521_v1 = vadd.f32 %v1884_v63, %v1879_v62  ;;  %v3644_v18 = vld [vmem:[%s4201_s22 + $0x20] sm:$0xff]  }
 0xcff   : > { %v1880_v0 = vmul.f32 %v1878_v58, %v1874_v60 }
 0xd01   : > { %v4523_v2 = vadd.f32 %v1884_v63, %v1880_v0 }
 0xd03   : > { %v1919_v3 = vpack.c.bf16 %v4523_v2, %v4521_v1 }
 0xd05   : > { %2129 = vmatmul.mubr.bf16.vlgmr.msra.gmra.mxu1 %v1919_v3  ;;  %2172 = vmatmul.mubr.bf16.vlgmr.msra.gmra.mxu0 %v1919_v3 }
 0xd06   : > { %3220 = vmatpush3.bf16.msra.mxu1 %v3632_v9  ;;  %3242 = vmatpush3.bf16.msra.mxu0 %v3633_v37 }
 0xd07   : > { %3221 = vmatprep.subr.bf16.mxu1 %v3634_v4  ;;  %3243 = vmatprep.subr.bf16.mxu0 %v3635_v10 }
 0xd0a   : > { %3222 = vmatpush3.bf16.msra.mxu1 %v3636_v11  ;;  %3244 = vmatpush3.bf16.msra.mxu0 %v3637_v7 }
 0xd0b   : > { %3223 = vmatprep.subr.bf16.mxu1 %v3638_v12  ;;  %3245 = vmatprep.subr.bf16.mxu0 %v3639_v13 }
 0xd0e   : > { %3224 = vmatpush3.bf16.msra.mxu1 %v3640_v16  ;;  %3246 = vmatpush3.bf16.msra.mxu0 %v3641_v14 }
 0xd0f   : > { %3225 = vmatprep.subr.bf16.mxu1 %v3642_v15  ;;  %3247 = vmatprep.subr.bf16.mxu0 %v3643_v17 }
 0xd12   : > { %3226 = vmatpush3.bf16.msra.mxu1 %v3644_v18  ;;  %3248 = vmatpush3.bf16.msra.mxu0 %v3645_v40 }
 0xd13   : > { %3227 = vmatprep.subr.bf16.mxu1 %v3646_v54  ;;  %3249 = vmatprep.subr.bf16.mxu0 %v3647_v61 }
 0xd16   : > { %3228 = vmatpush3.bf16.msra.mxu1 %v3648_v19  ;;  %3250 = vmatpush3.bf16.msra.mxu0 %v3649_v20 }
 0xd17   : > { %3229 = vmatprep.subr.bf16.mxu1 %v3650_v21  ;;  %3251 = vmatprep.subr.bf16.mxu0 %v3651_v22 }
 0xd1a   : > { %3230 = vmatpush3.bf16.msra.mxu1 %v3652_v23  ;;  %3252 = vmatpush3.bf16.msra.mxu0 %v3653_v24 }
 0xd1b   : > { %3231 = vmatprep.subr.bf16.mxu1 %v3654_v42  ;;  %3253 = vmatprep.subr.bf16.mxu0 %v3655_v47 }
 0xd1e   : > { %3232 = vmatpush3.bf16.msra.mxu1 %v3656_v25  ;;  %3254 = vmatpush3.bf16.msra.mxu0 %v3657_v51 }
 0xd1f   : > { %3233 = vmatprep.subr.bf16.mxu1 %v3658_v26  ;;  %3255 = vmatprep.subr.bf16.mxu0 %v3659_v27 }
 0xd22   : > { %3234 = vmatpush3.bf16.msra.mxu1 %v3660_v57  ;;  %3256 = vmatpush3.bf16.msra.mxu0 %v3661_v28 }
 0xdc5   : > { %v2130_v39 = vpop.f32.mrf.mxu1  ;;  %v2173_v41 = vpop.f32.mrf.mxu0 }
 0xdc6   : > { %v4567_v43 = vadd.f32 %v2130_v39, %v1923_v33  ;;  %v4569_v44 = vadd.f32 %v2173_v41, %v1931_v35 }
 0xdc7   : > { %v2132_v45 = vpop.f32.mrf.mxu1  ;;  %v2175_v46 = vpop.f32.mrf.mxu0 }
 0xdc8   : > { %v2190_v49 = vmul.f32 0.044715, %v4567_v43  ;;  %v2192_v50 = vmul.f32 0.044715, %v4569_v44  ;;  %v2133_v52 = vadd.f32 %v2132_v45, %v1927_v36  ;;  %v4573_v53 = vadd.f32 %v2175_v46, %v1935_v38 }
 0xdc9   : > { %v2134_v55 = vpop.f32.mrf.mxu1  ;;  %v2177_v56 = vpop.f32.mrf.mxu0 }
 0xdca   : > { %v2198_v58 = vmul.f32 %v2190_v49, %v4567_v43  ;;  %v2200_v5 = vmul.f32 %v2192_v50, %v4569_v44  ;;  %v2191_v59 = vmul.f32 0.044715, %v2133_v52  ;;  %v2193_v60 = vmul.f32 0.044715, %v4573_v53 }
 0xdcb   : > { %v2135_v62 = vadd.f32 %v2134_v55, %v1923_v33  ;;  %v4578_v63 = vadd.f32 %v2177_v56, %v1931_v35  ;;  %v2136_v0 = vpop.f32.mrf.mxu1  ;;  %v2179_v3 = vpop.f32.mrf.mxu0  ;;  %v2183_v45 = vmul.f32 0.5, %v2133_v52  ;;  %v2182_v49 = vmul.f32 0.5, %v4567_v43 }
 0xdcc   : > { %v2206_v6 = vmul.f32 %v2198_v58, %v4567_v43  ;;  %v2208_v8 = vmul.f32 %v2200_v5, %v4569_v44  ;;  %v2199_v9 = vmul.f32 %v2191_v59, %v2133_v52  ;;  %v2201_v37 = vmul.f32 %v2193_v60, %v4573_v53 }
 0xdcd   : > { %v2194_v4 = vmul.f32 0.044715, %v2135_v62  ;;  %v2196_v10 = vmul.f32 0.044715, %v4578_v63  ;;  %v2137_v11 = vadd.f32 %v2136_v0, %v1927_v36  ;;  %v2180_v7 = vadd.f32 %v2179_v3, %v1935_v38 }
 0xdce   : > { %v2214_v12 = vadd.f32 %v2206_v6, %v4567_v43  ;;  %v2216_v13 = vadd.f32 %v2208_v8, %v4569_v44  ;;  %v2207_v16 = vmul.f32 %v2199_v9, %v2133_v52  ;;  %v2209_v14 = vmul.f32 %v2201_v37, %v4573_v53 }
 0xdcf   : > { %v2202_v15 = vmul.f32 %v2194_v4, %v2135_v62  ;;  %v2204_v17 = vmul.f32 %v2196_v10, %v4578_v63  ;;  %v2195_v18 = vmul.f32 0.044715, %v2137_v11  ;;  %v2197_v40 = vmul.f32 0.044715, %v2180_v7 }
 0xdd0   : > { %v2222_v54 = vmul.f32 0.7978846, %v2214_v12  ;;  %v2224_v61 = vmul.f32 0.7978846, %v2216_v13  ;;  %v2215_v19 = vadd.f32 %v2207_v16, %v2133_v52  ;;  %v2217_v42 = vadd.f32 %v2209_v14, %v4573_v53 }
 0xdd1   : > { %v2210_v20 = vmul.f32 %v2202_v15, %v2135_v62  ;;  %v2212_v21 = vmul.f32 %v2204_v17, %v4578_v63  ;;  %v2203_v22 = vmul.f32 %v2195_v18, %v2137_v11  ;;  %v2205_v23 = vmul.f32 %v2197_v40, %v2180_v7 }
 0xdd2   : > { %v2223_v24 = vmul.f32 0.7978846, %v2215_v19  ;;  %3698 = vtanh.f32 %v2222_v54  ;;  %v2225_v27 = vmul.f32 0.7978846, %v2217_v42  ;;  %v2186_v58 = vmul.f32 0.5, %v2135_v62 }
 0xdd3   : > { %v2218_v47 = vadd.f32 %v2210_v20, %v2135_v62  ;;  %v2220_v25 = vadd.f32 %v2212_v21, %v4578_v63  ;;  %v2211_v51 = vmul.f32 %v2203_v22, %v2137_v11  ;;  %3700 = vtanh.f32 %v2224_v61 }
 0xdd4   : > { %v2213_v26 = vmul.f32 %v2205_v23, %v2180_v7  ;;  %3702 = vtanh.f32 %v2223_v24  ;;  %v2187_v0 = vmul.f32 0.5, %v2137_v11  ;;  %v2188_v6 = vmul.f32 0.5, %v4578_v63 }
 0xdd5   : > { %v2226_v57 = vmul.f32 0.7978846, %v2218_v47  ;;  %v2228_v28 = vmul.f32 0.7978846, %v2220_v25  ;;  %v2219_v29 = vadd.f32 %v2211_v51, %v2137_v11  ;;  %3704 = vtanh.f32 %v2225_v27 }
 0xdd6   : > { %v2221_v30 = vadd.f32 %v2213_v26, %v2180_v7  ;;  %v2185_v9 = vmul.f32 0.5, %v4573_v53  ;;  %v2189_v37 = vmul.f32 0.5, %v2180_v7  ;;  %v2184_v43 = vmul.f32 0.5, %v4569_v44 }
 0xdd7   : > { %3706 = vtanh.f32 %v2226_v57  ;;  %v2227_v33 = vmul.f32 0.7978846, %v2219_v29  ;;  %v2324_v53 = vsub.s32 5, %v4268_v32 }
 0xdd8   : > { %3708 = vtanh.f32 %v2228_v28  ;;  %v2229_v34 = vmul.f32 0.7978846, %v2221_v30 }
 0xdd9   : > { %3710 = vtanh.f32 %v2227_v33  ;;  %v2325_v54 = vrot.slane %v4562_v31, %v2324_v53 }
 0xdda   : > { %3712 = vtanh.f32 %v2229_v34 }
 0xddf   : > { %v3699_v35 = vpop.eup %3698 }
 0xde0   : > { %v3701_v48 = vpop.eup %3700  ;;  %v2238_v5 = vadd.f32 1.0, %v3699_v35 }
 0xde1   : > { %v3703_v36 = vpop.eup %3702  ;;  %v2240_v8 = vadd.f32 1.0, %v3701_v48 }
 0xde2   : > { %v3705_v38 = vpop.eup %3704  ;;  %v2239_v46 = vadd.f32 1.0, %v3703_v36  ;;  %v2246_v14 = vmul.f32 %v2238_v5, %v2182_v49 }
 0xde3   : > { %v2241_v56 = vadd.f32 1.0, %v3705_v38  ;;  %v2248_v17 = vmul.f32 %v2240_v8, %v2184_v43 }
 0xde4   : > { %v3707_v39 = vpop.eup %3706  ;;  %v2247_v10 = vmul.f32 %v2239_v46, %v2183_v45 }
 0xde5   : > { %v3709_v41 = vpop.eup %3708  ;;  %v2242_v50 = vadd.f32 1.0, %v3707_v39  ;;  %v2249_v16 = vmul.f32 %v2241_v56, %v2185_v9 }
 0xde6   : > { %v3711_v55 = vpop.eup %3710  ;;  %v2244_v59 = vadd.f32 1.0, %v3709_v41 }
 0xde7   : > { %v3713_v60 = vpop.eup %3712  ;;  %v2243_v3 = vadd.f32 1.0, %v3711_v55  ;;  %v2250_v52 = vmul.f32 %v2242_v50, %v2186_v58  ;;  %v2632_v50 = vsub.s32 7, %v4268_v32 }
 0xde8   : > { %v2245_v4 = vadd.f32 1.0, %v3713_v60  ;;  %v2252_v13 = vmul.f32 %v2244_v59, %v2188_v6 }
 0xde9   : > { %v2251_v12 = vmul.f32 %v2243_v3, %v2187_v0  ;;  %v2318_v18 = vpack.c.bf16 %v2250_v52, %v2246_v14  ;;  %v2633_v58 = vrot.slane %v4562_v31, %v2632_v50 }
 0xdea   : > { %v2253_v62 = vmul.f32 %v2245_v4, %v2189_v37  ;;  %v2320_v63 = vpack.c.bf16 %v2252_v13, %v2248_v17 }
 0xdeb   : > { %v2319_v15 = vpack.c.bf16 %v2251_v12, %v2247_v10 }
 0xdec   : > { %v2321_v11 = vpack.c.bf16 %v2253_v62, %v2249_v16 }
 0xded   : > { %2550 = vmatprep.mubr.bf16.mxu1 %v2319_v15 }
 0xdee   : > { %2591 = vmatprep.mubr.bf16.mxu0 %v2321_v11  ;;  %2551 = vmatmul.mubr.bf16.vlgmr.msra.gmra.mxu1 %v2318_v18 }
 0xdef   : > { %2592 = vmatmul.mubr.bf16.vlgmr.msra.gmra.mxu0 %v2320_v63 }
 0xeae   : > { %v3235_v7 = vpop.f32.mrf.mxu1 }
 0xeaf   : > { %v3257_v40 = vpop.f32.mrf.mxu0 }
 0xeb0   : > { %v3236_v44 = vpop.f32.mrf.mxu1 }
 0xeb1   : > { %v3237_v61 = vadd.f32 %v3236_v44, %v3235_v7  ;;  %v3258_v19 = vpop.f32.mrf.mxu0 }
 0xeb2   : > { %v3238_v20 = vpop.f32.mrf.mxu1  ;;  %v3259_v22 = vadd.f32 %v3258_v19, %v3257_v40 }
 0xeb3   : > { %v2553_v21 = vadd.f32 %v3237_v61, %v2325_v54  ;;  %v3260_v23 = vpop.f32.mrf.mxu0 }
 0xeb4   : > { %v3239_v24 = vpop.f32.mrf.mxu1 }
 0xeb5   : > { %v2594_v42 = vadd.f32 %v3259_v22, %v2553_v21  ;;  %v3240_v47 = vadd.f32 %v3239_v24, %v3238_v20  ;;  %v3261_v25 = vpop.f32.mrf.mxu0 }
 0xeb6   : > { %v3262_v26 = vadd.f32 %v3261_v25, %v3260_v23 }
 0xeb7   : > { %v2556_v51 = vadd.f32 %v3240_v47, %v2325_v54  ;;  %v2600_v27 = vadd.f32 %v2594_v42, %v4521_v1 }
 0xeb9   : > { %v2597_v57 = vadd.f32 %v3262_v26, %v2556_v51  ;;  %2602 = vadd.xlane.f32.xlu0 %v2600_v27 }
 0xebb   : > { %v2601_v28 = vadd.f32 %v2597_v57, %v4523_v2  ;;  %v2626_v2 = vsub.s32 6, %v4268_v32 }
 0xebd   : > { %2604 = vadd.xlane.f32.xlu1 %v2601_v28  ;;  %v2627_v55 = vrot.slane %v4562_v31, %v2626_v2 }
 0xf42   : > { %v2603_v29 = vpop.xlane.xlu0 %2602 }
 0xf43   : > { %v2606_v30 = vmul.f32 0.0078125, %v2603_v29 }
 0xf45   : > { %v2608_v33 = vsub.f32 %v2600_v27, %v2606_v30 }
 0xf46   : > { %v2605_v34 = vpop.xlane.xlu1 %2604 }
 0xf47   : > { %v2607_v35 = vmul.f32 0.0078125, %v2605_v34  ;;  %v2610_v48 = vmul.f32 %v2608_v33, %v2608_v33 }
 0xf49   : > { %v2609_v36 = vsub.f32 %v2601_v28, %v2607_v35  ;;  %2612 = vadd.xlane.f32.xlu0 %v2610_v48 }
 0xf4b   : > { %v2611_v38 = vmul.f32 %v2609_v36, %v2609_v36 }
 0xf4d   : > { %2614 = vadd.xlane.f32.xlu1 %v2611_v38 }
 0xfd2   : > { %v2613_v39 = vpop.xlane.xlu0 %2612 }
 0xfd3   : > { %v2616_v41 = vmul.f32 0.0078125, %v2613_v39 }
 0xfd5   : > { %v2618_v45 = vadd.f32 1e-12, %v2616_v41 }
 0xfd6   : > { %v2615_v46 = vpop.xlane.xlu1 %2614 }
 0xfd7   : > { %3714 = vrsqrt.f32 %v2618_v45  ;;  %v2617_v1 = vmul.f32 0.0078125, %v2615_v46 }
 0xfd9   : > { %v2619_v49 = vadd.f32 1e-12, %v2617_v1 }
 0xfdb   : > { %3716 = vrsqrt.f32 %v2619_v49 }
 0xfe4   : > { %v3715_v56 = vpop.eup %3714 }
 0xfe5   : > { %v2622_v5 = vmul.f32 %v3715_v56, %v2608_v33 }
 0xfe7   : > { %v2628_v59 = vmul.f32 %v2627_v55, %v2622_v5 }
 0xfe8   : > { %v3717_v60 = vpop.eup %3716 }
 0xfe9   : > { %v2634_v0 = vadd.f32 %v2633_v58, %v2628_v59  ;;  %v2623_v3 = vmul.f32 %v3717_v60, %v2609_v36 }
 0xfeb   : > { %2636 = vst [vmem:[#allocation2] sm:$0xff] %v2634_v0  ;;  %v2629_v6 = vmul.f32 %v2627_v55, %v2623_v3  ;;  %2641 = sbr.rel (%p3142_p3) target bundleno = 4523 (0x11ab), region = 84 }
 0xfed   : > { %v2635_v8 = vadd.f32 %v2633_v58, %v2629_v6 }
 0xfef   : > { %2637 = vst [vmem:[#allocation2 + $0x8] sm:$0xff] %v2635_v8 }
 0xff0   : > { %v3723_v32 = vld [vmem:[%s4705_s11 + $0x38] sm:$0xff]   ;;  %v3940_v9 = vmov 0.0   ;;  %v3724_v31 = vld [vmem:[%s4705_s11 + $0x30] sm:$0xff]   ;;  %vm3941_vm7 = vmmov 0   ;;  %v3725_v37 = vld [vmem:[%s4705_s11 + $0x28] sm:$0xff]   ;;  %v2660_v43 = vpack.c.bf16 %v2635_v8, %v2635_v8  ;;  %v2659_v62 = vpack.c.bf16 %v2634_v0, %v2634_v0 }
 0xff1   : > { %3417 = vmatprep.subr.bf16.mxu0 %v3940_v9  ;;  %3437 = vmatprep.subr.bf16.mxu1 %v3940_v9  ;;  %v3731_v4 = vld [vmem:[#allocation10 + $0x38] sm:$0xff]   ;;  %v3726_v52 = vld [vmem:[%s4705_s11 + $0x20] sm:$0xff]   ;;  %v3732_v10 = vld [vmem:[#allocation10 + $0x30] sm:$0xff]   ;;  %vm2670_vm8 = vcmask 1041409  }
 0xff2   : > { %3418 = vmatpush3.bf16.msra.mxu0 %v3723_v32  ;;  %3433 = vmatprep.mubr.msk.bf16.mxu0 %vm3941_vm7, %v3940_v9  ;;  %v3727_v12 = vld [vmem:[%s4705_s11 + $0x18] sm:$0xff]   ;;  %v3733_v13 = vld [vmem:[#allocation10 + $0x28] sm:$0xff]   ;;  %v3728_v16 = vld [vmem:[%s4705_s11 + $0x10] sm:$0xff]   ;;  %v2668_v14 = vunpack.c.l.b16 %v2660_v43  ;;  %v2667_v17 = vunpack.c.l.b16 %v2659_v62 }
 0xff3   : > { %3419 = vmatprep.subr.bf16.mxu0 %v3940_v9  ;;  %3453 = vmatprep.mubr.msk.bf16.mxu1 %vm3941_vm7, %v3940_v9  ;;  %v3729_v15 = vld [vmem:[%s4705_s11 + $0x8] sm:$0xff]   ;;  %v3730_v18 = vld [vmem:[%s4705_s11] sm:$0xff]   ;;  %v3735_v40 = vld [vmem:[#allocation10 + $0x18] sm:$0xff]  }
 0xff4   : > { %3438 = vmatpush3.bf16.msra.mxu1 %v3731_v4  ;;  %v2669_v11 = vrot.slane %v2668_v14, 7  ;;  %v3734_v7 = vld [vmem:[#allocation10 + $0x20] sm:$0xff]   ;;  %v3736_v54 = vld [vmem:[#allocation10 + $0x10] sm:$0xff]   ;;  %v3737_v44 = vld [vmem:[#allocation10 + $0x8] sm:$0xff]  }
 0xff5   : > { %3439 = vmatprep.subr.bf16.mxu1 %v3940_v9  ;;  %v3738_v61 = vld [vmem:[#allocation10] sm:$0xff]  }
 0xff6   : > { %3420 = vmatpush3.bf16.msra.mxu0 %v3724_v31  ;;  %v2671_v63 = vsel %vm2670_vm8, %v2669_v11, %v2667_v17  ;;  %v3143_v19 = vld [vmem:[%s4706_s13] ss:$0 sm:$0xff]  ;;  %v3152_v25 = vld [vmem:[%s4707_s7 + $0x1] ss:$0 sm:$0xff] }
 0xff7   : > { %3421 = vmatprep.subr.bf16.mxu0 %v3940_v9  ;;  %v2672_v53 = vpack.c.b16 %v2671_v63, %v2671_v63 }
 0xff8   : > { %3440 = vmatpush3.bf16.msra.mxu1 %v3732_v10 }
 0xff9   : > { %3441 = vmatprep.subr.bf16.mxu1 %v3940_v9 }
 0xffa   : > { %3422 = vmatpush3.bf16.msra.mxu0 %v3725_v37 }
 0xffb   : > { %3423 = vmatprep.subr.bf16.mxu0 %v3940_v9 }
 0xffc   : > { %3442 = vmatpush3.bf16.msra.mxu1 %v3733_v13 }
 0xffd   : > { %3443 = vmatprep.subr.bf16.mxu1 %v3940_v9 }
 0xffe   : > { %3424 = vmatpush3.bf16.msra.mxu0 %v3726_v52 }
 0xfff   : > { %3425 = vmatprep.subr.bf16.mxu0 %v3940_v9 }
0x1000   : > { %3444 = vmatpush3.bf16.msra.mxu1 %v3734_v7 }
0x1001   : > { %3445 = vmatprep.subr.bf16.mxu1 %v3940_v9 }
0x1002   : > { %3426 = vmatpush3.bf16.msra.mxu0 %v3727_v12 }
0x1003   : > { %3427 = vmatprep.subr.bf16.mxu0 %v3940_v9 }
0x1004   : > { %3446 = vmatpush3.bf16.msra.mxu1 %v3735_v40 }
0x1005   : > { %3447 = vmatprep.subr.bf16.mxu1 %v3940_v9 }
0x1006   : > { %3428 = vmatpush3.bf16.msra.mxu0 %v3728_v16 }
0x1007   : > { %3429 = vmatprep.subr.bf16.mxu0 %v3940_v9 }
0x1008   : > { %3448 = vmatpush3.bf16.msra.mxu1 %v3736_v54 }
0x1009   : > { %3449 = vmatprep.subr.bf16.mxu1 %v3940_v9 }
0x100a   : > { %3430 = vmatpush3.bf16.msra.mxu0 %v3729_v15 }
0x100b   : > { %3431 = vmatprep.subr.bf16.mxu0 %v3940_v9 }
0x100c   : > { %3450 = vmatpush3.bf16.msra.mxu1 %v3737_v44 }
0x100d   : > { %3451 = vmatprep.subr.bf16.mxu1 %v3940_v9 }
0x100e   : > { %3432 = vmatpush3.bf16.msra.mxu0 %v3730_v18 }
0x1010   : > { %3452 = vmatpush3.bf16.msra.mxu1 %v3738_v61 }
0x1011   : > { %3434 = vmatmul.mubr.bf16.vlgmr.msra.gmra.mxu0 %v2672_v53 }
0x10d1   : > { %v2756_v20 = vpop.f32.mrf.mxu0 }
0x10d2   : > { %v2757_v21 = vadd.f32 %v3143_v19, %v2756_v20 }
0x10d3   : > { %v3435_v22 = vpop.f32.mrf.mxu0 }
0x10d4   : > { %3739 = vtanh.f32 %v2757_v21 }
0x10d5   : > { %v2759_v23 = vpop.f32.mrf.mxu0 }
0x10d7   : > { %v3436_v24 = vpop.f32.mrf.mxu0 }
0x10e1   : > { %v3740_v42 = vpop.eup %3739 }
0x10e2   : > { %v2780_v47 = vpack.c.bf16 %v3740_v42, %v3740_v42 }
0x10e4   : > { %3454 = vmatmul.mubr.bf16.vlgmr.msra.gmra.mxu1 %v2780_v47 }
0x11a4   : > { %v2867_v51 = vpop.f32.mrf.mxu1 }
0x11a5   : > { %v2868_v26 = vadd.f32 %v3152_v25, %v2867_v51 }
0x11a6   : > { %v3455_v27 = vpop.f32.mrf.mxu1 }
0x11a7   : > { %v2873_v57 = vmax.f32 %v2868_v26, 0.0 }
0x11a8   : > { %v2870_v28 = vpop.f32.mrf.mxu1 }
0x11a9   : > { %2874 = vst [vmem:[#allocation12] sm:$0x3] %v2873_v57 }
0x11aa   : > { %v3456_v29 = vpop.f32.mrf.mxu1 }
0x11ab PF: > { %p3491_p11 = scmp.eq.s32.totalorder %s4093_s20, 1  ;;  %s3942_s0 = smov [#allocation12]  }
0x11ac   : > { %s2882_s4 = sshll.u32 %s3942_s0, 4  ;;  %s2883_s4 = int_to_ptr.vmem [resolvable:$true] %s2882_s4 }
0x11ad   : > { %s3851_s22 = scalar_lea.vmem %s2883_s4, 32  ;;  %p3858_p4 = scmp.lt.s32.totalorder %s2883_s4, %s2883_s4 }
0x11ae   : > { %p3852_p12 = scmp.ne.s32.totalorder %s2883_s4, %s3851_s22  ;;  %p3859_p6 = scmp.lt.s32.totalorder %s3851_s22, %s3851_s22 }
0x11b0   : > { %p3853_p2 = pnand %p3852_p12, %p3491_p11  ;;  %p3860_p8 = por %p3859_p6, %p3858_p4 }
0x11b2   : > { %p3854_p13 = pneg %p3853_p2 }
0x11b4   : > { %p3861_p7 = pnand %p3860_p8, %p3854_p13 }
0x11b6   : > { %3864 = shalt.err (!%p3861_p7)
}
0x11b7   : > { %s4708_s16 = sld [smem:[#allocation25_spill]] }
0x11bd   : > { %3471 = dma.vmem_to_hbm [thread:$0]  (%p3491_p11), %s2883_s4, 32, %s4708_s16, [#allocation6]  }
0x11be   : > { %3904 = dma.done.wait (%p3491_p11), [#allocation6], 32  }
0x11bf   : > { %3906 = vsyncadd (%p3491_p11), [#allocation6], 4294967264 }
0x11c0 PF: > { %s4709_s16 = sld [smem:[#allocation18_spill]]  ;;  %s4712_s13 = smov %s3913_s14 }
0x11c1   : > { %s4710_s1 = sld [smem:[#allocation17_spill]] }
0x11c2   : > { %s4711_s15 = sld [smem:[#allocation19_spill]] }
0x11c6   : > { %p25_p10 = scmp.ge.s32.totalorder %s4709_s16, 4  }
0x11c7   : > { %s4713_s14 = smov %s4710_s1 }
0x11c8   :  { %27 = sbr.rel (!%p25_p10) target bundleno = 14 (0xe), region = 139 }
0x11cd   :  { %2895 = vsyncpa [#allocation5], 1 }
0x11ce   :  { %2897 = vsyncpa [#allocation5 + $0x1], 1 }
0x11cf   :  { %2898 = vsyncpa [#allocation8], 1 }
0x11d0   :  { %2900 = vsyncpa [#allocation8 + $0x1], 1 }
0x11d1   :  { %2901 = vsyncpa [#allocation11], 1 }
0x11d2   :  { %2902 = vsyncpa [#allocation6], 1 }
0x11d3   :  { %2904 = vsyncpa [#allocation6 + $0x1], 1 }

</bundles_post_ra>
